<compile_context>
chip_gen: v7x
topology: tpu7x:2x2x1
jax: 0.10.0
libtpu: 0.0.40
codegen_flags: <defaults>
</compile_context>

<pallas_src>
import functools

import jax
import jax.numpy as jnp
import numpy as np
from jax import lax
from jax.experimental import pallas as pl
from jax.experimental.pallas import tpu as pltpu


def _round_up(x, m):
    return ((x + m - 1) // m) * m


def _conv_relu_kernel(x_ref, w_ref, b_ref, o_ref, *, k_h, k_w, stride,
                      row_tile, w_out, n_batch, c_in, c_out_pad):
    """One grid step computes `row_tile` output rows for the whole batch.

    x_ref: (N, Hp, Wp, Cin)             f32  full padded image (block reused
                                             across grid steps)
    w_ref: (KH*KW*Cin, Cout_pad)        bf16 im2col-folded weights
    b_ref: (1, Cout_pad)                f32
    o_ref: (N, row_tile, Wo, Cout_pad)  f32  lane-dense (minor dim % 128 == 0)
    """
    r = pl.program_id(0)
    row_start = r * row_tile * stride
    if (row_tile * stride) % 8 == 0:
        row_start = pl.multiple_of(row_start, 8)
    th_in = (row_tile - 1) * stride + k_h        # input rows incl. halo

    # Load only the input-row window this tile needs.
    x_win = x_ref[:, pl.ds(row_start, th_in), :, :]       # (N, th_in, Wp, Cin)

    # im2col: stack the KH*KW shifted/strided taps on the contraction axis so
    # the whole convolution becomes a single MXU matmul.
    pieces = []
    for kh in range(k_h):
        for kw in range(k_w):
            piece = lax.slice(
                x_win,
                start_indices=(0, kh, kw, 0),
                limit_indices=(n_batch,
                               kh + (row_tile - 1) * stride + 1,
                               kw + (w_out - 1) * stride + 1,
                               c_in),
                strides=(1, stride, stride, 1))           # (N, row_tile, Wo, Cin)
            pieces.append(piece)
    patch = jnp.concatenate(pieces, axis=-1)              # (N, row_tile, Wo, K*K*Cin)
    m = n_batch * row_tile * w_out
    patch2d = patch.reshape(m, k_h * k_w * c_in)

    # bf16 x bf16 -> f32 accumulation on the MXU (one push per grid step).
    acc = jnp.dot(patch2d.astype(jnp.bfloat16), w_ref[...],
                  preferred_element_type=jnp.float32)     # (M, Cout_pad)
    acc = acc + b_ref[...]                                # bias (broadcast)
    acc = jnp.maximum(acc, 0.0)                           # fused ReLU
    # Lane-dense store: minor dim is Cout_pad (multiple of 128).
    o_ref[...] = acc.reshape(n_batch, row_tile, w_out, c_out_pad).astype(o_ref.dtype)


def conv_relu_pallas(x_nchw, weight, bias, *, stride, padding, row_tile=8):
    """ConvolutionLayer.forward: ReLU(Conv2d(x)).

    x_nchw: (N, Cin, H, W)       float32
    weight: (Cout, Cin, KH, KW)  float32 (PyTorch Conv2d layout)
    bias:   (Cout,)              float32
    """
    n, c_in, h, w = x_nchw.shape
    c_out, _, k_h, k_w = weight.shape
    pad = int(padding)
    stride = int(stride)
    h_out = (h + 2 * pad - k_h) // stride + 1
    w_out = (w + 2 * pad - k_w) // stride + 1
    hp, wp = h + 2 * pad, w + 2 * pad

    if h_out % row_tile != 0:
        row_tile = h_out                 # fall back to a single row tile
    n_row_tiles = h_out // row_tile

    kkc = k_h * k_w * c_in
    c_out_pad = _round_up(c_out, 128)    # lane-dense output / MXU-wide RHS

    # --- layout glue (plain XLA): NCHW -> NHWC + spatial zero padding ---
    # TODO(synk): for production-size images, tile the input block over rows
    # with a halo index_map (and fold these transposes into the kernel) so the
    # full padded image never has to be VMEM-resident on v7x's 64 MiB VMEM.
    x_nhwc = jnp.transpose(x_nchw, (0, 2, 3, 1))
    x_pad = jnp.pad(x_nhwc, ((0, 0), (pad, pad), (pad, pad), (0, 0)))

    # Weights: (Cout, Cin, KH, KW) -> (KH, KW, Cin, Cout) -> (KH*KW*Cin, Cout_pad), bf16.
    w_im2col = jnp.transpose(weight, (2, 3, 1, 0)).reshape(kkc, c_out)
    w_im2col = jnp.pad(w_im2col, ((0, 0), (0, c_out_pad - c_out))).astype(jnp.bfloat16)
    b_pad = jnp.pad(bias, (0, c_out_pad - c_out)).reshape(1, c_out_pad).astype(jnp.float32)

    kernel = functools.partial(
        _conv_relu_kernel, k_h=k_h, k_w=k_w, stride=stride,
        row_tile=row_tile, w_out=w_out, n_batch=n, c_in=c_in,
        c_out_pad=c_out_pad)

    out_nhwc = pl.pallas_call(
        kernel,
        out_shape=jax.ShapeDtypeStruct((n, h_out, w_out, c_out_pad), jnp.float32),
        grid_spec=pltpu.PrefetchScalarGridSpec(
            num_scalar_prefetch=0,
            grid=(n_row_tiles,),
            in_specs=[
                # Full padded image: block index constant -> fetched once,
                # reused across the (parallel) row-tile grid axis.
                pl.BlockSpec((n, hp, wp, c_in), lambda r: (0, 0, 0, 0)),
                pl.BlockSpec((kkc, c_out_pad), lambda r: (0, 0)),
                pl.BlockSpec((1, c_out_pad), lambda r: (0, 0)),
            ],
            out_specs=pl.BlockSpec((n, row_tile, w_out, c_out_pad),
                                   lambda r: (0, r, 0, 0)),
        ),
        compiler_params=pltpu.CompilerParams(
            dimension_semantics=("parallel",)),
    )(x_pad, w_im2col, b_pad)

    # Back to PyTorch NCHW, dropping the Cout padding (fuses into one XLA op).
    return jnp.transpose(out_nhwc[..., :c_out], (0, 3, 1, 2))


def _reference_conv_relu(x_nchw, weight, bias, *, stride, padding):
    out = lax.conv_general_dilated(
        x_nchw, weight,
        window_strides=(stride, stride),
        padding=((padding, padding), (padding, padding)),
        dimension_numbers=("NCHW", "OIHW", "NCHW"))
    out = out + bias.reshape(1, -1, 1, 1)
    return jnp.maximum(out, 0.0)


if __name__ == "__main__":
    # ConvolutionLayer(input_channels=4, output_channels=8,
    #                  kernel_size=3, stride=1, padding=1)
    N, C_IN, H, W = 2, 4, 16, 16
    C_OUT, K, STRIDE, PAD = 8, 3, 1, 1

    key = jax.random.PRNGKey(0)
    kx, kw, kb = jax.random.split(key, 3)

    x = jax.random.normal(kx, (N, C_IN, H, W), dtype=jnp.float32)
    # Deterministic parameter init (Conv2d-style uniform bound).
    fan_in = C_IN * K * K
    bound = 1.0 / np.sqrt(fan_in)
    weight = jax.random.uniform(kw, (C_OUT, C_IN, K, K),
                                minval=-bound, maxval=bound,
                                dtype=jnp.float32)
    bias = jax.random.uniform(kb, (C_OUT,), minval=-bound, maxval=bound,
                              dtype=jnp.float32)

    out = conv_relu_pallas(x, weight, bias, stride=STRIDE, padding=PAD)
    out = jax.block_until_ready(out)

    ref = _reference_conv_relu(x, weight, bias, stride=STRIDE, padding=PAD)
    # bf16 matmul operands (f32 accumulation) -> relaxed tolerance vs f32 ref.
    np.testing.assert_allclose(np.asarray(out), np.asarray(ref),
                               rtol=2e-2, atol=2e-2)
    print("KERNEL_OK")
</pallas_src>

<mosaic_0001>
module attributes {stable_mosaic.version = 11 : i64} {
  func.func @_conv_relu_kernel(%arg0: i32, %arg1: memref<2x18x18x4xf32, #tpu.memory_space<vmem>>, %arg2: memref<36x128xbf16, #tpu.memory_space<vmem>>, %arg3: memref<1x128xf32, #tpu.memory_space<vmem>>, %arg4: memref<2x8x16x128xf32, #tpu.memory_space<vmem>>) attributes {dimension_semantics = [#tpu.dimension_semantics<parallel>], iteration_bounds = array<i64: 2>, scalar_prefetch = 0 : i64, scratch_operands = 0 : i64, tpu.core_type = #tpu.core_type<tc>, window_params = [{pipeline_mode = #tpu.pipeline_mode<synchronous>, transform_indices = @transform_0, window_bounds = array<i64: 2, 18, 18, 4>}, {pipeline_mode = #tpu.pipeline_mode<synchronous>, transform_indices = @transform_1, window_bounds = array<i64: 36, 128>}, {pipeline_mode = #tpu.pipeline_mode<synchronous>, transform_indices = @transform_2, window_bounds = array<i64: 1, 128>}, {transform_indices = @transform_3, window_bounds = array<i64: 2, 8, 16, 128>}]} {
    %c8_i32 = arith.constant 8 : i32
    %0 = arith.muli %arg0, %c8_i32 : i32
    %c1_i32 = arith.constant 1 : i32
    %1 = arith.muli %0, %c1_i32 : i32
    %2 = tpu.assume_multiple %1, 8 : i32
    %c0 = arith.constant 0 : index
    %3 = arith.index_cast %2 : i32 to index
    %c0_0 = arith.constant 0 : index
    %c0_1 = arith.constant 0 : index
    %4 = vector.load %arg1[%c0, %3, %c0_0, %c0_1] : memref<2x18x18x4xf32, #tpu.memory_space<vmem>>, vector<2x10x18x4xf32>
    %5 = vector.extract_strided_slice %4 {offsets = [0, 0, 0, 0], sizes = [2, 8, 16, 4], strides = [1, 1, 1, 1]} : vector<2x10x18x4xf32> to vector<2x8x16x4xf32>
    %6 = vector.extract_strided_slice %4 {offsets = [0, 0, 1, 0], sizes = [2, 8, 16, 4], strides = [1, 1, 1, 1]} : vector<2x10x18x4xf32> to vector<2x8x16x4xf32>
    %7 = vector.extract_strided_slice %4 {offsets = [0, 0, 2, 0], sizes = [2, 8, 16, 4], strides = [1, 1, 1, 1]} : vector<2x10x18x4xf32> to vector<2x8x16x4xf32>
    %8 = vector.extract_strided_slice %4 {offsets = [0, 1, 0, 0], sizes = [2, 8, 16, 4], strides = [1, 1, 1, 1]} : vector<2x10x18x4xf32> to vector<2x8x16x4xf32>
    %9 = vector.extract_strided_slice %4 {offsets = [0, 1, 1, 0], sizes = [2, 8, 16, 4], strides = [1, 1, 1, 1]} : vector<2x10x18x4xf32> to vector<2x8x16x4xf32>
    %10 = vector.extract_strided_slice %4 {offsets = [0, 1, 2, 0], sizes = [2, 8, 16, 4], strides = [1, 1, 1, 1]} : vector<2x10x18x4xf32> to vector<2x8x16x4xf32>
    %11 = vector.extract_strided_slice %4 {offsets = [0, 2, 0, 0], sizes = [2, 8, 16, 4], strides = [1, 1, 1, 1]} : vector<2x10x18x4xf32> to vector<2x8x16x4xf32>
    %12 = vector.extract_strided_slice %4 {offsets = [0, 2, 1, 0], sizes = [2, 8, 16, 4], strides = [1, 1, 1, 1]} : vector<2x10x18x4xf32> to vector<2x8x16x4xf32>
    %13 = vector.extract_strided_slice %4 {offsets = [0, 2, 2, 0], sizes = [2, 8, 16, 4], strides = [1, 1, 1, 1]} : vector<2x10x18x4xf32> to vector<2x8x16x4xf32>
    %14 = tpu.concatenate %5, %6, %7, %8, %9, %10, %11, %12, %13 in 3 : vector<2x8x16x4xf32>, vector<2x8x16x4xf32>, vector<2x8x16x4xf32>, vector<2x8x16x4xf32>, vector<2x8x16x4xf32>, vector<2x8x16x4xf32>, vector<2x8x16x4xf32>, vector<2x8x16x4xf32>, vector<2x8x16x4xf32> -> vector<2x8x16x36xf32>
    %15 = vector.shape_cast %14 : vector<2x8x16x36xf32> to vector<256x36xf32>
    %16 = arith.truncf %15 : vector<256x36xf32> to vector<256x36xbf16>
    %c0_2 = arith.constant 0 : index
    %c0_3 = arith.constant 0 : index
    %17 = vector.load %arg2[%c0_2, %c0_3] : memref<36x128xbf16, #tpu.memory_space<vmem>>, vector<36x128xbf16>
    %cst = arith.constant dense<0.000000e+00> : vector<256x128xf32>
    %18 = tpu.matmul %16, %17, %cst {dimension_numbers = #tpu.dot_dimension_numbers<[1], [0], [0], [1], [0, 0, 1, 1], [], []>} : vector<256x36xbf16>, vector<36x128xbf16>, vector<256x128xf32> -> vector<256x128xf32>
    %c0_4 = arith.constant 0 : index
    %c0_5 = arith.constant 0 : index
    %19 = vector.load %arg3[%c0_4, %c0_5] : memref<1x128xf32, #tpu.memory_space<vmem>>, vector<1x128xf32>
    %20 = vector.broadcast %19 : vector<1x128xf32> to vector<256x128xf32>
    %21 = arith.addf %18, %20 : vector<256x128xf32>
    %cst_6 = arith.constant 0.000000e+00 : f32
    %22 = vector.broadcast %cst_6 : f32 to vector<256x128xf32>
    %23 = arith.maximumf %21, %22 : vector<256x128xf32>
    %24 = vector.shape_cast %23 : vector<256x128xf32> to vector<2x8x16x128xf32>
    %c0_7 = arith.constant 0 : index
    %c0_8 = arith.constant 0 : index
    %c0_9 = arith.constant 0 : index
    %c0_10 = arith.constant 0 : index
    %25 = vector.load %arg4[%c0_7, %c0_8, %c0_9, %c0_10] : memref<2x8x16x128xf32, #tpu.memory_space<vmem>>, vector<2x8x16x128xf32>
    tpu.vector_store %arg4[%c0_7, %c0_8, %c0_9, %c0_10], %24 {strides = array<i32>} : memref<2x8x16x128xf32, #tpu.memory_space<vmem>>, vector<2x8x16x128xf32>,
    return
  }
  func.func @transform_0(%arg0: i32) -> (i32, i32, i32, i32) {
    %c0_i32 = arith.constant 0 : i32
    %c0_i32_0 = arith.constant 0 : i32
    %c0_i32_1 = arith.constant 0 : i32
    %c0_i32_2 = arith.constant 0 : i32
    %c0_i32_3 = arith.constant 0 : i32
    return %c0_i32, %c0_i32_0, %c0_i32_1, %c0_i32_2 : i32, i32, i32, i32
  }
  func.func @transform_1(%arg0: i32) -> (i32, i32) {
    %c0_i32 = arith.constant 0 : i32
    %c0_i32_0 = arith.constant 0 : i32
    %c0_i32_1 = arith.constant 0 : i32
    return %c0_i32, %c0_i32_0 : i32, i32
  }
  func.func @transform_2(%arg0: i32) -> (i32, i32) {
    %c0_i32 = arith.constant 0 : i32
    %c0_i32_0 = arith.constant 0 : i32
    %c0_i32_1 = arith.constant 0 : i32
    return %c0_i32, %c0_i32_0 : i32, i32
  }
  func.func @transform_3(%arg0: i32) -> (i32, i32, i32, i32) {
    %c0_i32 = arith.constant 0 : i32
    %c0_i32_0 = arith.constant 0 : i32
    %c0_i32_1 = arith.constant 0 : i32
    %c0_i32_2 = arith.constant 0 : i32
    return %c0_i32, %arg0, %c0_i32_0, %c0_i32_1 : i32, i32, i32, i32
  }
}

</mosaic_0001>

<bundles_post_ra>
// kernel: tpu_custom_call.1
= control target key start
LH: loop header
LB: loop body
LE: loop exit
PB: predicated region body
PF: predicated region fallthrough
CT: control target
= control target key end

     0   :  { %8 = vsyncpa [#allocation3], 0  ;;  %s4375_s0 = inlined_call_operand.vmem [shape: f32[2,18,18,4], index: 0, kind: input, shape index: {}]   ;;  %s4376_s1 = inlined_call_operand.vmem [shape: bf16[36,128], index: 1, kind: input, shape index: {}]   ;;  %s4377_s2 = inlined_call_operand.vmem [shape: f32[1,128], index: 2, kind: input, shape index: {}]   ;;  %s4378_s3 = inlined_call_operand.hbm [shape: f32[2,16,16,128], index: 3, kind: output, shape index: {}]  }
   0x1   :  { %10 = vsyncpa [#allocation3 + $0x1], 0  ;;  %s2818_s12 = smov 0   ;;  %s2820_s13 = smov 0  }
   0x2   :  { %s2822_s14 = smov 0   ;;  %s2824_s15 = smov 0  }
   0x3 LB: > { %s2839_s16 = sadd.s32 4294967295, %s2781_s15   ;;  %s1925_s17 = sadd.s32 4294967294, %s2781_s15   ;;  %s2781_s15 = sphi %s2824_s15, %s4496_s15   ;;  %s2777_s14 = sphi %s2822_s14, %s4495_s14   ;;  %s2773_s13 = sphi %s2820_s13, %s4494_s13   ;;  %s2769_s12 = sphi %s2818_s12, %s4493_s12  }
   0x4   : > { %s2843_s18 = sadd.s32 1, %s2781_s15   ;;  %s86_s19 = sadd.s32 1, %s2777_s14 }
   0x5   : > { %s83_s20 = ssub.s32 %s2781_s15, %s2843_s18  ;;  %p96_p0 = scmp.ne.s32.totalorder %s2777_s14, %s2773_s13 }
   0x6   : > { %p84_p1 = scmp.eq.s32.totalorder %s83_s20, 0  ;;  %p97_p2 = scmp.eq.s32.totalorder %s2839_s16, 1 }
   0x7   : > { %p102_p3 = scmp.ne.s32.totalorder %s2773_s13, %s2769_s12  ;;  %p103_p4 = scmp.eq.s32.totalorder %s1925_s17, 1 }
   0x8   : > { %s2854_s21 = scalar_select %p84_p1, %s2777_s14, %s86_s19  }
   0x9   : > { %p2856_p5 = por %p97_p2, %p96_p0  ;;  %p2860_p6 = por %p103_p4, %p102_p3 }
   0xa   : > { %p1927_p7 = scmp.ge.s32.totalorder %s2781_s15, 1  ;;  %p130_p8 = scmp.lt.s32.totalorder %s2781_s15, 3 }
   0xc   : > { %p131_p9 = pnand %p1927_p7, %p130_p8 }
   0xe   : > { %134 = sbr.rel (%p131_p9) target bundleno = 633 (0x279), region = 32 }
  0x15   : > { %s1930_s24 = smul.u32 192, %s2839_s16  ;;  %vm262_vm0 = vcmask 1046528   ;;  %s2783_s28 = smov 4   ;;  %vm439_vm1 = vcmask 1045504   ;;  %vm1600_vm2 = vcmask 1041408   ;;  %vm1244_vm3 = vcmask 31744  }
  0x16   : > { %s2784_s29 = smov 8   ;;  %s2785_s30 = smov 12   ;;  %vm1277_vm4 = vcmask 64512   ;;  %vm1310_vm5 = vcmask 97280   ;;  %vm1343_vm6 = vcmask 130048   ;;  %vm1376_vm7 = vcmask 162816  }
  0x17   : > { %s2870_s27 = scalar_lea.vmem %s4375_s0, %s1930_s24  ;;  %s2786_s4 = smov 16   ;;  %vm1409_vm8 = vcmask 195584   ;;  %vm1442_vm9 = vcmask 228352   ;;  %vm1475_vm10 = vcmask 261120   ;;  %vm1551_vm11 = vcmask 293888  }
  0x18   : > { %v2873_v0 = vld [vmem:[%s2870_s27 + $0x30] sm:$0xff]  ;;  %v2876_v1 = vld [vmem:[%s2870_s27 + $0x38] sm:$0xff]  ;;  %v2879_v2 = vld [vmem:[%s2870_s27 + $0x40] sm:$0x3]  ;;  %s2787_s5 = smov 20   ;;  %s2788_s6 = smov 24  }
  0x19   : > { %v273_v3 = vrot.slane %v2873_v0, 1  ;;  %v274_v4 = vrot.slane %v2876_v1, 1  ;;  %v276_v5 = vrot.slane %v2879_v2, 1  ;;  %v2885_v6 = vld [vmem:[%s2870_s27] sm:$0xff]  ;;  %v2888_v7 = vld [vmem:[%s2870_s27 + $0x8] sm:$0xff]  ;;  %v2899_v12 = vld [vmem:[%s2870_s27 + $0x50] sm:$0xff] }
  0x1a   : > { %v2891_v8 = vld [vmem:[%s2870_s27 + $0x10] sm:$0x3]  ;;  %v263_v9 = vrot.slane %v2885_v6, 1  ;;  %v264_v10 = vrot.slane %v2888_v7, 1  ;;  %v2896_v11 = vld [vmem:[%s2870_s27 + $0x48] sm:$0xff]  ;;  %v2908_v17 = vld [vmem:[%s2870_s27 + $0x18] sm:$0xff] }
  0x1b   : > { %v275_v13 = vsel %vm262_vm0, %v273_v3, %v274_v4  ;;  %v277_v14 = vsel %vm262_vm0, %v274_v4, %v276_v5  ;;  %v266_v15 = vrot.slane %v2891_v8, 1  ;;  %v2905_v16 = vld [vmem:[%s2870_s27 + $0x58] sm:$0x3]  ;;  %v2911_v18 = vld [vmem:[%s2870_s27 + $0x20] sm:$0xff]  ;;  %v278_v21 = vrot.slane %v2896_v11, 1  ;;  %v2943_v36 = vld [vmem:[%s2870_s27 + $0x68] sm:$0xff] }
  0x1c   : > { %v2913_v19 = vpack.i.bf16 %v277_v14, %v275_v13  ;;  %v265_v20 = vsel %vm262_vm0, %v263_v9, %v264_v10  ;;  %v279_v22 = vrot.slane %v2899_v12, 1  ;;  %v2919_v23 = vld [vmem:[%s2870_s27 + $0x28] sm:$0x3]  ;;  %v2922_v24 = vld [vmem:[%s2870_s27 + $0x78] sm:$0xff]  ;;  %v2925_v25 = vld [vmem:[%s2870_s27 + $0x80] sm:$0xff]  ;;  %v281_v27 = vrot.slane %v2905_v16, 1 }
  0x1d   : > { %v267_v26 = vsel %vm262_vm0, %v264_v10, %v266_v15  ;;  %v268_v28 = vrot.slane %v2908_v17, 1  ;;  %v269_v29 = vrot.slane %v2911_v18, 1  ;;  %v2932_v30 = vld [vmem:[%s2870_s27 + $0x88] sm:$0x3]  ;;  %v2935_v31 = vld [vmem:[%s2870_s27 + $0x60] sm:$0xff]  ;;  %v271_v34 = vrot.slane %v2919_v23, 1 }
  0x1e   : > { %4415 = vst [vmem:[#allocation7_spill] sm:$0xff] %v2913_v19  ;;  %2095 = vrot.lane.b32.xlu1 %v2913_v19, %s2783_s28  ;;  %v2084_v32 = vpack.i.bf16 %v267_v26, %v265_v20  ;;  %v280_v33 = vsel %vm262_vm0, %v278_v21, %v279_v22  ;;  %v288_v35 = vrot.slane %v2922_v24, 1  ;;  %v2946_v37 = vld [vmem:[%s2870_s27 + $0x70] sm:$0x3]  ;;  %v282_v38 = vsel %vm262_vm0, %v279_v22, %v281_v27  ;;  %v2953_v42 = vld [vmem:[%s2870_s27 + $0xa8] sm:$0xff]  ;;  %v2971_v50 = vld [vmem:[%s2870_s27 + $0x98] sm:$0xff] }
  0x1f   : > { %v270_v39 = vsel %vm262_vm0, %v268_v28, %v269_v29  ;;  %v289_v40 = vrot.slane %v2925_v25, 1  ;;  %v291_v41 = vrot.slane %v2932_v30, 1  ;;  %v2956_v43 = vld [vmem:[%s2870_s27 + $0xb0] sm:$0xff]  ;;  %v2959_v44 = vpack.i.bf16 %v282_v38, %v280_v33  ;;  %v2965_v48 = vld [vmem:[%s2870_s27 + $0xb8] sm:$0x3]  ;;  %v2982_v56 = vld [vmem:[%s2870_s27 + $0x1c8] sm:$0xff] }
  0x20   : > { %2085 = vrot.lane.b32.xlu0 %v2084_v32, %s2783_s28  ;;  %v272_v45 = vsel %vm262_vm0, %v269_v29, %v271_v34  ;;  %v283_v46 = vrot.slane %v2935_v31, 1  ;;  %v284_v47 = vrot.slane %v2943_v36, 1  ;;  %v2968_v49 = vld [vmem:[%s2870_s27 + $0x90] sm:$0xff]  ;;  %v286_v54 = vrot.slane %v2946_v37, 1  ;;  %v2979_v55 = vld [vmem:[%s2870_s27 + $0xa0] sm:$0x3] }
  0x21   : > { %4416 = vst [vmem:[#allocation8_spill] sm:$0xff] %v2959_v44  ;;  %v2973_v51 = vpack.i.bf16 %v272_v45, %v270_v39  ;;  %v290_v52 = vsel %vm262_vm0, %v288_v35, %v289_v40  ;;  %v292_v53 = vsel %vm262_vm0, %v289_v40, %v291_v41  ;;  %v298_v59 = vrot.slane %v2953_v42, 1  ;;  %v2992_v61 = vld [vmem:[%s2870_s27 + $0x1d0] sm:$0xff]  ;;  %v2995_v62 = vld [vmem:[%s2870_s27 + $0x1d8] sm:$0x3]  ;;  %v3025_v32 = vld [vmem:[%s2870_s27 + $0x200] sm:$0xff] }
  0x22   : > { %2100 = vrot.lane.b32.xlu1 %v2959_v44, %s2783_s28  ;;  %v2986_v57 = vpack.i.bf16 %v292_v53, %v290_v52  ;;  %v285_v58 = vsel %vm262_vm0, %v283_v46, %v284_v47  ;;  %v299_v60 = vrot.slane %v2956_v43, 1  ;;  %v287_v63 = vsel %vm262_vm0, %v284_v47, %v286_v54  ;;  %v3002_v9 = vld [vmem:[%s2870_s27 + $0x1b0] sm:$0xff]  ;;  %v3005_v10 = vld [vmem:[%s2870_s27 + $0x1b8] sm:$0xff]  ;;  %v3015_v21 = vld [vmem:[%s2870_s27 + $0x1c0] sm:$0x3]  ;;  %s2789_s11 = smov 28  }
  0x23   : > { %4417 = vst [vmem:[#allocation9_spill] sm:$0xff] %v2973_v51  ;;  %v301_v3 = vrot.slane %v2965_v48, 1  ;;  %v293_v4 = vrot.slane %v2968_v49, 1  ;;  %v294_v5 = vrot.slane %v2971_v50, 1  ;;  %v3009_v13 = vpack.i.bf16 %v287_v63, %v285_v58  ;;  %v3022_v29 = vld [vmem:[%s2870_s27 + $0x1f8] sm:$0xff]  ;;  %v3038_v40 = vld [vmem:[%s2870_s27 + $0x1e0] sm:$0xff] }
  0x24   : > { %4418 = vst [vmem:[#allocation10_spill] sm:$0xff] %v2986_v57  ;;  %2090 = vrot.lane.b32.xlu0 %v2973_v51, %s2783_s28  ;;  %v300_v14 = vsel %vm262_vm0, %v298_v59, %v299_v60  ;;  %v296_v15 = vrot.slane %v2979_v55, 1  ;;  %v308_v20 = vrot.slane %v2982_v56, 1  ;;  %v309_v27 = vrot.slane %v2992_v61, 1  ;;  %v3035_v39 = vld [vmem:[%s2870_s27 + $0x208] sm:$0x3] }
  0x25   : > { %4419 = vst [vmem:[#allocation11_spill] sm:$0xff] %v3009_v13  ;;  %v302_v22 = vsel %vm262_vm0, %v299_v60, %v301_v3  ;;  %v295_v26 = vsel %vm262_vm0, %v293_v4, %v294_v5  ;;  %v311_v28 = vrot.slane %v2995_v62, 1  ;;  %v303_v35 = vrot.slane %v3002_v9, 1  ;;  %v3041_v41 = vld [vmem:[%s2870_s27 + $0x1e8] sm:$0xff]  ;;  %v3047_v52 = vld [vmem:[%s2870_s27 + $0x1f0] sm:$0x3] }
  0x26   : > { %2110 = vrot.lane.b32.xlu1 %v2986_v57, %s2783_s28  ;;  %v3029_v33 = vpack.i.bf16 %v302_v22, %v300_v14  ;;  %v297_v34 = vsel %vm262_vm0, %v294_v5, %v296_v15  ;;  %v304_v38 = vrot.slane %v3005_v10, 1  ;;  %v310_v45 = vsel %vm262_vm0, %v308_v20, %v309_v27  ;;  %v3057_v60 = vld [vmem:[%s2870_s27 + $0x228] sm:$0xff]  ;;  %v3060_v63 = vld [vmem:[%s2870_s27 + $0x230] sm:$0xff]  ;;  %v3063_v3 = vld [vmem:[%s2870_s27 + $0x238] sm:$0x3]  ;;  %s2790_s20 = smov 32  }
  0x27   : > { %v312_v46 = vsel %vm262_vm0, %v309_v27, %v311_v28  ;;  %v306_v47 = vrot.slane %v3015_v21, 1  ;;  %v3051_v53 = vpack.i.bf16 %v297_v34, %v295_v26  ;;  %v318_v58 = vrot.slane %v3022_v29, 1  ;;  %v3070_v20 = vld [vmem:[%s2870_s27 + $0x210] sm:$0xff]  ;;  %v3073_v22 = vld [vmem:[%s2870_s27 + $0x218] sm:$0xff]  ;;  %v3082_v34 = vld [vmem:[%s2870_s27 + $0x220] sm:$0x3] }
  0x28   : > { %4420 = vst [vmem:[#allocation12_spill] sm:$0xff] %v3029_v33  ;;  %2105 = vrot.lane.b32.xlu0 %v3009_v13, %s2783_s28  ;;  %v305_v54 = vsel %vm262_vm0, %v303_v35, %v304_v38  ;;  %v319_v59 = vrot.slane %v3025_v32, 1  ;;  %v321_v5 = vrot.slane %v3035_v39, 1  ;;  %v313_v14 = vrot.slane %v3038_v40, 1  ;;  %4422 = vst [vmem:[#allocation14_spill] sm:$0xff] %v3070_v20  ;;  %v3089_v13 = vld [vmem:[%s2870_s27 + $0x258] sm:$0xff] }
  0x29   : > { %4421 = vst [vmem:[#allocation13_spill] sm:$0xff] %v3051_v53  ;;  %v307_v4 = vsel %vm262_vm0, %v304_v38, %v306_v47  ;;  %v314_v15 = vrot.slane %v3041_v41, 1  ;;  %4423 = vst [vmem:[#allocation15_spill] sm:$0xff] %v3073_v22  ;;  %v3077_v26 = vpack.i.bf16 %v312_v46, %v310_v45  ;;  %v316_v28 = vrot.slane %v3047_v52, 1  ;;  %v3092_v45 = vld [vmem:[%s2870_s27 + $0x260] sm:$0xff]  ;;  %s146_s24 = sand.u32 1, %s2773_s13  }
  0x2a   : > { %2120 = vrot.lane.b32.xlu1 %v3029_v33, %s2783_s28  ;;  %v320_v27 = vsel %vm262_vm0, %v318_v58, %v319_v59  ;;  %4425 = vst [vmem:[#allocation17_spill] sm:$0xff] %v3082_v34  ;;  %v322_v35 = vsel %vm262_vm0, %v319_v59, %v321_v5  ;;  %v328_v38 = vrot.slane %v3057_v60, 1  ;;  %v329_v47 = vrot.slane %v3060_v63, 1  ;;  %4426 = vst [vmem:[#allocation18_spill] sm:$0xff] %v3089_v13  ;;  %v3099_v5 = vld [vmem:[%s2870_s27 + $0x268] sm:$0x3] }
  0x2b   : > { %4424 = vst [vmem:[#allocation16_spill] sm:$0xff] %v3077_v26  ;;  %v331_v57 = vrot.slane %v3063_v3, 1  ;;  %4427 = vst [vmem:[#allocation19_spill] sm:$0xff] %v3092_v45  ;;  %v2124_v46 = vpack.i.bf16 %v307_v4, %v305_v54  ;;  %v323_v58 = vrot.slane %v3070_v20, 1  ;;  %v324_v59 = vrot.slane %v3073_v22, 1  ;;  %v3111_v4 = vld [vmem:[%s2870_s27 + $0x240] sm:$0xff] }
  0x2c   : > { %2115 = vrot.lane.b32.xlu0 %v3051_v53, %s2783_s28  ;;  %v315_v33 = vsel %vm262_vm0, %v313_v14, %v314_v15  ;;  %v317_v44 = vsel %vm262_vm0, %v314_v15, %v316_v28  ;;  %v326_v51 = vrot.slane %v3082_v34, 1  ;;  %v3106_v19 = vpack.i.bf16 %v322_v35, %v320_v27  ;;  %v3114_v22 = vld [vmem:[%s2870_s27 + $0x248] sm:$0xff]  ;;  %v3117_v20 = vld [vmem:[%s2870_s27 + $0x250] sm:$0x3] }
  0x2d   : > { %v338_v53 = vrot.slane %v3089_v13, 1  ;;  %v339_v54 = vrot.slane %v3092_v45, 1  ;;  %v330_v14 = vsel %vm262_vm0, %v328_v38, %v329_v47  ;;  %v332_v15 = vsel %vm262_vm0, %v329_v47, %v331_v57 }
  0x2e   : > { %2130 = vrot.lane.b32.xlu1 %v3077_v26, %s2783_s28  ;;  %v341_v28 = vrot.slane %v3099_v5, 1  ;;  %v3123_v27 = vpack.i.bf16 %v317_v44, %v315_v33  ;;  %v325_v35 = vsel %vm262_vm0, %v323_v58, %v324_v59  ;;  %v327_v26 = vsel %vm262_vm0, %v324_v59, %v326_v51 }
  0x2f   : > { %v333_v45 = vrot.slane %v3111_v4, 1  ;;  %v334_v13 = vrot.slane %v3114_v22, 1  ;;  %v336_v34 = vrot.slane %v3117_v20, 1  ;;  %v3132_v57 = vpack.i.bf16 %v332_v15, %v330_v14 }
  0x30   : > { %2125 = vrot.lane.b32.xlu0 %v2124_v46, %s2783_s28  ;;  %v340_v38 = vsel %vm262_vm0, %v338_v53, %v339_v54  ;;  %v342_v44 = vsel %vm262_vm0, %v339_v54, %v341_v28  ;;  %v445_v33 = vrot.slane %v2908_v17, 2  ;;  %v446_v47 = vrot.slane %v2911_v18, 2 }
  0x31   : > { %v448_v51 = vrot.slane %v2919_v23, 2  ;;  %v443_v46 = vrot.slane %v2891_v8, 2  ;;  %v3142_v58 = vpack.i.bf16 %v327_v26, %v325_v35  ;;  %v335_v59 = vsel %vm262_vm0, %v333_v45, %v334_v13 }
  0x32   : > { %2140 = vrot.lane.b32.xlu1 %v3106_v19, %s2783_s28  ;;  %v337_v53 = vsel %vm262_vm0, %v334_v13, %v336_v34  ;;  %v440_v54 = vrot.slane %v2885_v6, 2  ;;  %v441_v14 = vrot.slane %v2888_v7, 2  ;;  %v3150_v23 = vpack.i.bf16 %v342_v44, %v340_v38 }
  0x33   : > { %v455_v8 = vrot.slane %v2896_v11, 2  ;;  %v456_v15 = vrot.slane %v2899_v12, 2  ;;  %v458_v26 = vrot.slane %v2905_v16, 2  ;;  %v447_v28 = vsel %vm439_vm1, %v445_v33, %v446_v47 }
  0x34   : > { %2135 = vrot.lane.b32.xlu0 %v3123_v27, %s2783_s28  ;;  %4428 = vst [vmem:[#allocation20_spill] sm:$0xff] %v3150_v23  ;;  %v449_v45 = vsel %vm439_vm1, %v446_v47, %v448_v51  ;;  %v453_v13 = vrot.slane %v2879_v2, 2  ;;  %v3160_v6 = vpack.i.bf16 %v337_v53, %v335_v59  ;;  %v450_v7 = vrot.slane %v2873_v0, 2 }
  0x35   : > { %v451_v34 = vrot.slane %v2876_v1, 2  ;;  %v442_v35 = vsel %vm439_vm1, %v440_v54, %v441_v14  ;;  %v444_v38 = vsel %vm439_vm1, %v441_v14, %v443_v46  ;;  %v465_v16 = vrot.slane %v2922_v24, 2 }
  0x36   : > { %2150 = vrot.lane.b32.xlu1 %v3132_v57, %s2783_s28  ;;  %v466_v44 = vrot.slane %v2925_v25, 2  ;;  %v3170_v2 = vpack.i.bf16 %v449_v45, %v447_v28  ;;  %v457_v33 = vsel %vm439_vm1, %v455_v8, %v456_v15  ;;  %v459_v47 = vsel %vm439_vm1, %v456_v15, %v458_v26 }
  0x37   : > { %v468_v51 = vrot.slane %v2932_v30, 2  ;;  %v2164_v59 = vpack.i.bf16 %v444_v38, %v442_v35  ;;  %v452_v46 = vsel %vm439_vm1, %v450_v7, %v451_v34  ;;  %v454_v53 = vsel %vm439_vm1, %v451_v34, %v453_v13 }
  0x38   : > { %2145 = vrot.lane.b32.xlu0 %v3142_v58, %s2783_s28  ;;  %v460_v54 = vrot.slane %v2935_v31, 2  ;;  %v3180_v14 = vpack.i.bf16 %v459_v47, %v457_v33  ;;  %v467_v28 = vsel %vm439_vm1, %v465_v16, %v466_v44  ;;  %v461_v8 = vrot.slane %v2943_v36, 2 }
  0x39   : > { %v463_v15 = vrot.slane %v2946_v37, 2  ;;  %v469_v30 = vsel %vm439_vm1, %v466_v44, %v468_v51  ;;  %v475_v26 = vrot.slane %v2953_v42, 2  ;;  %v476_v45 = vrot.slane %v2956_v43, 2 }
  0x3a   : > { %2160 = vrot.lane.b32.xlu1 %v3150_v23, %s2783_s28  ;;  %v478_v13 = vrot.slane %v2965_v48, 2  ;;  %v470_v7 = vrot.slane %v2968_v49, 2  ;;  %v471_v34 = vrot.slane %v2971_v50, 2  ;;  %v473_v35 = vrot.slane %v2979_v55, 2 }
  0x3b   : > { %v3195_v37 = vpack.i.bf16 %v454_v53, %v452_v46  ;;  %v3197_v38 = vpack.i.bf16 %v469_v30, %v467_v28  ;;  %v462_v16 = vsel %vm439_vm1, %v460_v54, %v461_v8  ;;  %v464_v44 = vsel %vm439_vm1, %v461_v8, %v463_v15 }
  0x3c   : > { %2155 = vrot.lane.b32.xlu0 %v3160_v6, %s2783_s28  ;;  %v485_v33 = vrot.slane %v2982_v56, 2  ;;  %v477_v48 = vsel %vm439_vm1, %v475_v26, %v476_v45  ;;  %v479_v47 = vsel %vm439_vm1, %v476_v45, %v478_v13  ;;  %v486_v55 = vrot.slane %v2992_v61, 2 }
  0x3d   : > { %v488_v51 = vrot.slane %v2995_v62, 2  ;;  %v474_v46 = vsel %vm439_vm1, %v471_v34, %v473_v35  ;;  %v480_v53 = vrot.slane %v3002_v9, 2  ;;  %v481_v54 = vrot.slane %v3005_v10, 2 }
  0x3e   : > { %2170 = vrot.lane.b32.xlu1 %v3170_v2, %s2784_s29  ;;  %v3214_v28 = vpack.i.bf16 %v464_v44, %v462_v16  ;;  %v483_v8 = vrot.slane %v3015_v21, 2  ;;  %v495_v15 = vrot.slane %v3022_v29, 2  ;;  %v496_v30 = vrot.slane %v3025_v32, 2 }
  0x3f   : > { %v498_v62 = vrot.slane %v3035_v39, 2  ;;  %v3222_v26 = vpack.i.bf16 %v479_v47, %v477_v48  ;;  %v487_v10 = vsel %vm439_vm1, %v485_v33, %v486_v55  ;;  %v489_v45 = vsel %vm439_vm1, %v486_v55, %v488_v51  ;;  %v4431_v51 = vld [vmem:[#allocation15_spill] sm:$0xff] }
  0x40   : > { %2165 = vrot.lane.b32.xlu0 %v2164_v59, %s2784_s29  ;;  %v472_v59 = vsel %vm439_vm1, %v470_v7, %v471_v34  ;;  %v482_v13 = vsel %vm439_vm1, %v480_v53, %v481_v54  ;;  %v490_v21 = vrot.slane %v3038_v40, 2  ;;  %v491_v7 = vrot.slane %v3041_v41, 2 }
  0x41   : > { %4429 = vst [vmem:[#allocation21_spill] sm:$0xff] %v3222_v26  ;;  %v3224_v9 = vpack.i.bf16 %v474_v46, %v472_v59  ;;  %v493_v34 = vrot.slane %v3047_v52, 2  ;;  %v484_v39 = vsel %vm439_vm1, %v481_v54, %v483_v8  ;;  %v505_v35 = vrot.slane %v3057_v60, 2  ;;  %v4430_v52 = vld [vmem:[#allocation14_spill] sm:$0xff]  ;;  %v4432_v46 = vld [vmem:[#allocation17_spill] sm:$0xff] }
  0x42   : > { %2180 = vrot.lane.b32.xlu1 %v3180_v14, %s2784_s29  ;;  %v506_v16 = vrot.slane %v3060_v63, 2  ;;  %v508_v44 = vrot.slane %v3063_v3, 2  ;;  %v497_v33 = vsel %vm439_vm1, %v495_v15, %v496_v30  ;;  %v499_v48 = vsel %vm439_vm1, %v496_v30, %v498_v62 }
  0x43   : > { %v3242_v47 = vpack.i.bf16 %v489_v45, %v487_v10  ;;  %v500_v55 = vrot.slane %v4430_v52, 2  ;;  %v501_v59 = vrot.slane %v4431_v51, 2  ;;  %v503_v53 = vrot.slane %v4432_v46, 2  ;;  %v4433_v10 = vld [vmem:[#allocation18_spill] sm:$0xff] }
  0x44   : > { %2175 = vrot.lane.b32.xlu0 %v3195_v37, %s2784_s29  ;;  %v2204_v54 = vpack.i.bf16 %v484_v39, %v482_v13  ;;  %v492_v8 = vsel %vm439_vm1, %v490_v21, %v491_v7  ;;  %v494_v3 = vsel %vm439_vm1, %v491_v7, %v493_v34  ;;  %v3251_v15 = vpack.i.bf16 %v499_v48, %v497_v33 }
  0x45   : > { %v507_v30 = vsel %vm439_vm1, %v505_v35, %v506_v16  ;;  %v509_v62 = vsel %vm439_vm1, %v506_v16, %v508_v44  ;;  %v515_v45 = vrot.slane %v4433_v10, 2  ;;  %v518_v46 = vrot.slane %v3099_v5, 2 }
  0x46   : > { %2190 = vrot.lane.b32.xlu1 %v3197_v38, %s2784_s29  ;;  %v510_v13 = vrot.slane %v3111_v4, 2  ;;  %v511_v21 = vrot.slane %v3114_v22, 2  ;;  %v3262_v7 = vpack.i.bf16 %v494_v3, %v492_v8  ;;  %v502_v34 = vsel %vm439_vm1, %v500_v55, %v501_v59 }
  0x47   : > { %v504_v39 = vsel %vm439_vm1, %v501_v59, %v503_v53  ;;  %v513_v35 = vrot.slane %v3117_v20, 2  ;;  %v3267_v16 = vpack.i.bf16 %v509_v62, %v507_v30  ;;  %v2244_v53 = vpack.i.bf16 %v2911_v18, %v2908_v17  ;;  %v178_v17 = vld [vmem:[%s2870_s27 + $0xc0] sm:$0xff]  ;;  %v179_v18 = vld [vmem:[%s2870_s27 + $0xc8] sm:$0xff] }
  0x48   : > { %2185 = vrot.lane.b32.xlu0 %v3214_v28, %s2784_s29  ;;  %v3270_v5 = vpack.i.bf16 %v504_v39, %v502_v34  ;;  %v512_v48 = vsel %vm439_vm1, %v510_v13, %v511_v21  ;;  %v3319_v8 = vpack.i.bf16 %v2925_v25, %v2922_v24  ;;  %v3332_v3 = vpack.i.bf16 %v3041_v41, %v3038_v40  ;;  %v209_v41 = vld [vmem:[%s2870_s27 + $0x278] sm:$0xff]  ;;  %v210_v34 = vld [vmem:[%s2870_s27 + $0x280] sm:$0x3]  ;;  %v180_v39 = vld [vmem:[%s2870_s27 + $0xd0] sm:$0x3] }
  0x49   : > { %v514_v55 = vsel %vm439_vm1, %v511_v21, %v513_v35  ;;  %v2284_v30 = vpack.i.bf16 %v2992_v61, %v2982_v56  ;;  %v3341_v62 = vpack.i.bf16 %v4431_v51, %v4430_v52  ;;  %v3346_v40 = vpack.i.bf16 %v3025_v32, %v3022_v29  ;;  %v208_v61 = vld [vmem:[%s2870_s27 + $0x270] sm:$0xff] }
  0x4a   : > { %2200 = vrot.lane.b32.xlu1 %v3222_v26, %s2784_s29  ;;  %v4434_v26 = vld [vmem:[#allocation19_spill] sm:$0xff]  ;;  %v3284_v59 = vpack.i.bf16 %v514_v55, %v512_v48  ;;  %v3352_v56 = vpack.i.bf16 %v3114_v22, %v3111_v4  ;;  %v718_v13 = vrot.slane %v178_v17, 1  ;;  %v724_v29 = vrot.slane %v209_v41, 1 }
  0x4b   : > { %v516_v23 = vrot.slane %v4434_v26, 2  ;;  %v723_v32 = vrot.slane %v208_v61, 1  ;;  %v3364_v21 = vpack.i.bf16 %v209_v41, %v208_v61  ;;  %v726_v35 = vrot.slane %v210_v34, 1 }
  0x4c   : > { %2195 = vrot.lane.b32.xlu0 %v3224_v9, %s2784_s29  ;;  %4437 = vst [vmem:[#allocation17_spill] sm:$0xff] %v3352_v56 }
  0x4d   : > { %v517_v44 = vsel %vm439_vm1, %v515_v45, %v516_v23  ;;  %v519_v33 = vsel %vm439_vm1, %v516_v23, %v518_v46  ;;  %v3290_v23 = vpack.i.bf16 %v2876_v1, %v2873_v0  ;;  %v3307_v0 = vpack.i.bf16 %v2899_v12, %v2896_v11 }
  0x4e   : > { %2210 = vrot.lane.b32.xlu1 %v3242_v47, %s2784_s29  ;;  %v3282_v20 = vpack.i.bf16 %v519_v33, %v517_v44  ;;  %v2269_v1 = vpack.i.bf16 %v2971_v50, %v2968_v49  ;;  %v3322_v11 = vpack.i.bf16 %v179_v18, %v178_v17  ;;  %v2274_v12 = vpack.i.bf16 %v2956_v43, %v2953_v42 }
  0x4f   : > { %v3360_v45 = vpack.i.bf16 %v3060_v63, %v3057_v60  ;;  %v719_v46 = vrot.slane %v179_v18, 1  ;;  %v721_v44 = vrot.slane %v180_v39, 1  ;;  %v3372_v33 = vpack.i.bf16 %v4434_v26, %v4433_v10 }
  0x50   : > { %2205 = vrot.lane.b32.xlu0 %v2204_v54, %s2784_s29  ;;  %4435 = vst [vmem:[#allocation14_spill] sm:$0xff] %v3282_v20  ;;  %v3302_v54 = vpack.i.bf16 %v2943_v36, %v2935_v31  ;;  %4436 = vst [vmem:[#allocation15_spill] sm:$0xff] %v3322_v11  ;;  %v725_v48 = vsel %vm262_vm0, %v723_v32, %v724_v29  ;;  %v727_v55 = vsel %vm262_vm0, %v724_v29, %v726_v35  ;;  %v4438_v29 = vld [vmem:[#allocation7_spill] sm:$0xff] }
  0x51   : > { %v829_v32 = vrot.slane %v208_v61, 2  ;;  %v827_v35 = vrot.slane %v180_v39, 2 }
  0x52   : > { %2220 = vrot.lane.b32.xlu1 %v3251_v15, %s2784_s29 }
  0x54   : > { %2215 = vrot.lane.b32.xlu0 %v3262_v7, %s2784_s29 }
  0x56   : > { %2230 = vrot.lane.b32.xlu1 %v3267_v16, %s2784_s29 }
  0x58   : > { %2225 = vrot.lane.b32.xlu0 %v3270_v5, %s2784_s29 }
  0x5a   : > { %2240 = vrot.lane.b32.xlu1 %v3282_v20, %s2784_s29  ;;  %v824_v20 = vrot.slane %v178_v17, 2 }
  0x5c   : > { %2235 = vrot.lane.b32.xlu0 %v3284_v59, %s2784_s29  ;;  %s1830_s29 = scalar_lea.sflag [#allocation3], %s146_s24 }
  0x5e   : > { %2250 = vrot.lane.b32.xlu1 %v3290_v23, %s2785_s30 }
  0x60   : > { %2245 = vrot.lane.b32.xlu0 %v2244_v53, %s2785_s30  ;;  %v720_v53 = vsel %vm262_vm0, %v718_v13, %v719_v46  ;;  %v832_v13 = vrot.slane %v210_v34, 2  ;;  %v4441_v34 = vld [vmem:[#allocation8_spill] sm:$0xff] }
  0x62   : > { %2260 = vrot.lane.b32.xlu1 %v3302_v54, %s2785_s30 }
  0x64   : > { %2255 = vrot.lane.b32.xlu0 %v3307_v0, %s2785_s30 }
  0x66   : > { %2270 = vrot.lane.b32.xlu1 %v2269_v1, %s2785_s30  ;;  %v3379_v1 = vpack.i.bf16 %v727_v55, %v725_v48  ;;  %v4439_v48 = vld [vmem:[#allocation9_spill] sm:$0xff] }
  0x68   : > { %2265 = vrot.lane.b32.xlu0 %v3319_v8, %s2785_s30 }
  0x6a   : > { %2280 = vrot.lane.b32.xlu1 %v3322_v11, %s2785_s30  ;;  %v825_v11 = vrot.slane %v179_v18, 2  ;;  %v4440_v18 = vld [vmem:[#allocation16_spill] sm:$0xff] }
  0x6c   : > { %2275 = vrot.lane.b32.xlu0 %v2274_v12, %s2785_s30  ;;  %v722_v12 = vsel %vm262_vm0, %v719_v46, %v721_v44  ;;  %v826_v55 = vsel %vm439_vm1, %v824_v20, %v825_v11  ;;  %v828_v61 = vsel %vm439_vm1, %v825_v11, %v827_v35  ;;  %v2724_v20 = vld [vmem:[%s4376_s1] sm:$0xff]  }
  0x6d   : > { %1978 = vmatprep.subr.bf16.mxu0 %v2724_v20  ;;  %2016 = vmatprep.subr.bf16.mxu1 %v2724_v20 }
  0x6e   : > { %2290 = vrot.lane.b32.xlu1 %v3332_v3, %s2785_s30  ;;  %1979 = vmatpush3.bf16.msra.mxu0 %v2724_v20 }
  0x6f   : > { %2019 = vmatpush3.bf16.msra.mxu1 %v2724_v20 }
  0x70   : > { %2285 = vrot.lane.b32.xlu0 %v2284_v30, %s2785_s30  ;;  %v3382_v30 = vpack.i.bf16 %v722_v12, %v720_v53 }
  0x72   : > { %2300 = vrot.lane.b32.xlu1 %v3341_v62, %s2785_s30 }
  0x74   : > { %2295 = vrot.lane.b32.xlu0 %v3346_v40, %s2785_s30 }
  0x76   : > { %2310 = vrot.lane.b32.xlu1 %v3352_v56, %s2785_s30  ;;  %v830_v56 = vrot.slane %v209_v41, 2  ;;  %v3398_v41 = vpack.i.bf16 %v828_v61, %v826_v55 }
  0x78   : > { %2305 = vrot.lane.b32.xlu0 %v3360_v45, %s2785_s30  ;;  %v831_v46 = vsel %vm439_vm1, %v829_v32, %v830_v56  ;;  %v833_v44 = vsel %vm439_vm1, %v830_v56, %v832_v13 }
  0x79   : > { %v3395_v17 = vpack.i.bf16 %v833_v44, %v831_v46 }
  0x7a   : > { %2320 = vrot.lane.b32.xlu1 %v3364_v21, %s2785_s30 }
  0x7c   : > { %2315 = vrot.lane.b32.xlu0 %v3372_v33, %s2785_s30 }
  0x7e   : > { %2330 = vrot.lane.b32.xlu1 %v4438_v29, %s2786_s4 }
  0x80   : > { %2325 = vrot.lane.b32.xlu0 %v4439_v48, %s2786_s4  ;;  %v4444_v48 = vld [vmem:[#allocation11_spill] sm:$0xff] }
  0x82   : > { %2340 = vrot.lane.b32.xlu1 %v4440_v18, %s2786_s4 }
  0x84   : > { %2335 = vrot.lane.b32.xlu0 %v4441_v34, %s2786_s4 }
  0x86   : > { %2350 = vrot.lane.b32.xlu1 %v3170_v2, %s2787_s5 }
  0x88   : > { %2345 = vrot.lane.b32.xlu0 %v3123_v27, %s2786_s4 }
  0x8a   : > { %2360 = vrot.lane.b32.xlu1 %v3195_v37, %s2787_s5 }
  0x8c   : > { %2355 = vrot.lane.b32.xlu0 %v3242_v47, %s2787_s5  ;;  %v2725_v47 = vld [vmem:[%s4376_s1 + $0x8] sm:$0xff]  }
  0x8d   : > { %1980 = vmatprep.subr.bf16.mxu0 %v2725_v47  ;;  %2017 = vmatprep.subr.bf16.mxu1 %v2725_v47 }
  0x8e   : > { %2370 = vrot.lane.b32.xlu1 %v3290_v23, %s2788_s6  ;;  %1981 = vmatpush3.bf16.msra.mxu0 %v2725_v47 }
  0x8f   : > { %2020 = vmatpush3.bf16.msra.mxu1 %v2725_v47 }
  0x90   : > { %2365 = vrot.lane.b32.xlu0 %v3262_v7, %s2787_s5  ;;  %v3417_v2 = vpop.permute.xlu1 %2095 }
  0x92   : > { %v3419_v11 = vpop.permute.xlu0 %2085  ;;  %2380 = vrot.lane.b32.xlu1 %v3307_v0, %s2788_s6  ;;  %v2726_v0 = vld [vmem:[%s4376_s1 + $0x10] ss:$0 sps:$4 sm:$0x33]  }
  0x93   : > { %2022 = vmatprep.subr.msk.bf16.mxu0 %vm1600_vm2, %v2726_v0  ;;  %2023 = vmatprep.subr.msk.bf16.mxu1 %vm1600_vm2, %v2726_v0  ;;  %v1602_v53 = vsel %vm1600_vm2, %v2726_v0, 0 }
  0x94   : > { %2375 = vrot.lane.b32.xlu0 %v3332_v3, %s2788_s6  ;;  %v3428_v23 = vpop.permute.xlu1 %2100  ;;  %1983 = vmatpush3.bf16.msra.mxu0 %v1602_v53 }
  0x95   : > { %2021 = vmatpush3.bf16.msra.mxu1 %v1602_v53 }
  0x96   : > { %v3430_v56 = vpop.permute.xlu0 %2090  ;;  %2390 = vrot.lane.b32.xlu1 %v4438_v29, %s2789_s11 }
  0x98   : > { %2385 = vrot.lane.b32.xlu0 %v3346_v40, %s2788_s6  ;;  %v2111_v3 = vpop.permute.xlu1 %2110 }
  0x99   : > { %v2113_v18 = vunpack.i.h.bf16 %v2111_v3  ;;  %v2112_v61 = vunpack.i.l.bf16 %v2111_v3 }
  0x9a   : > { %v2106_v39 = vpop.permute.xlu0 %2105  ;;  %2400 = vrot.lane.b32.xlu1 %v4441_v34, %s2789_s11 }
  0x9b   : > { %v1256_v53 = vsel %vm1244_vm3, %v2925_v25, %v2113_v18  ;;  %v1255_v3 = vsel %vm1244_vm3, %v2922_v24, %v2112_v61 }
  0x9c   : > { %2395 = vrot.lane.b32.xlu0 %v3123_v27, %s2789_s11  ;;  %v2121_v12 = vpop.permute.xlu1 %2120 }
  0x9e   : > { %v3443_v32 = vpop.permute.xlu0 %2115  ;;  %2410 = vrot.lane.b32.xlu1 %v3195_v37, %s2790_s20 }
  0x9f   : > { %v2117_v18 = vunpack.i.l.bf16 %v3443_v32 }
  0xa0   : > { %2405 = vrot.lane.b32.xlu0 %v3106_v19, %s2789_s11  ;;  %v3449_v40 = vpop.permute.xlu1 %2130 }
  0xa2   : > { %v3451_v29 = vpop.permute.xlu0 %2125  ;;  %2420 = vrot.lane.b32.xlu1 %v3180_v14, %s2790_s20 }
  0xa4   : > { %2415 = vrot.lane.b32.xlu0 %v3262_v7, %s2790_s20  ;;  %v3457_v27 = vpop.permute.xlu1 %2140 }
  0xa5   : > { %4442 = vst [vmem:[#allocation18_spill] sm:$0xff] %v3457_v27 }
  0xa6   : > { %v3459_v13 = vpop.permute.xlu0 %2135  ;;  %2430 = vrot.lane.b32.xlu1 %v3106_v19, %s2786_s4 }
  0xa7   : > { %4443 = vst [vmem:[#allocation19_spill] sm:$0xff] %v3459_v13  ;;  %v2122_v13 = vunpack.i.l.bf16 %v2121_v12 }
  0xa8   : > { %2425 = vrot.lane.b32.xlu0 %v3251_v15, %s2790_s20  ;;  %v3465_v37 = vpop.permute.xlu1 %2150 }
  0xaa   : > { %v3467_v35 = vpop.permute.xlu0 %2145  ;;  %2440 = vrot.lane.b32.xlu1 %v3142_v58, %s2786_s4 }
  0xac   : > { %2435 = vrot.lane.b32.xlu0 %v4444_v48, %s2786_s4  ;;  %v3473_v7 = vpop.permute.xlu1 %2160 }
  0xae   : > { %v3475_v46 = vpop.permute.xlu0 %2155  ;;  %2450 = vrot.lane.b32.xlu1 %v3251_v15, %s2787_s5  ;;  %v2107_v15 = vunpack.i.l.bf16 %v2106_v39 }
  0xb0   : > { %2445 = vrot.lane.b32.xlu0 %v3180_v14, %s2787_s5  ;;  %v3481_v19 = vpop.permute.xlu1 %2170  ;;  %v2108_v14 = vunpack.i.h.bf16 %v2106_v39  ;;  %v1253_v24 = vsel %vm1244_vm3, %v2935_v31, %v2107_v15  ;;  %v1259_v31 = vsel %vm1244_vm3, %v2953_v42, %v2122_v13 }
  0xb2   : > { %v3483_v44 = vpop.permute.xlu0 %2165  ;;  %2460 = vrot.lane.b32.xlu1 %v3270_v5, %s2787_s5  ;;  %v1254_v25 = vsel %vm1244_vm3, %v2943_v36, %v2108_v14 }
  0xb4   : > { %2455 = vrot.lane.b32.xlu0 %v3214_v28, %s2787_s5  ;;  %v3489_v55 = vpop.permute.xlu1 %2180 }
  0xb5   : > { %4445 = vst [vmem:[#allocation7_spill] sm:$0xff] %v3489_v55  ;;  %v2123_v55 = vunpack.i.h.bf16 %v2121_v12  ;;  %v2118_v12 = vunpack.i.h.bf16 %v3443_v32 }
  0xb6   : > { %v3491_v34 = vpop.permute.xlu0 %2175  ;;  %2470 = vrot.lane.b32.xlu1 %v3341_v62, %s2788_s6 }
  0xb7   : > { %v1260_v36 = vsel %vm1244_vm3, %v2956_v43, %v2123_v55  ;;  %v1257_v43 = vsel %vm1244_vm3, %v2968_v49, %v2117_v18 }
  0xb8   : > { %2465 = vrot.lane.b32.xlu0 %v3302_v54, %s2788_s6  ;;  %v2191_v20 = vpop.permute.xlu1 %2190 }
  0xb9   : > { %v2193_v47 = vunpack.i.h.bf16 %v2191_v20  ;;  %v2192_v0 = vunpack.i.l.bf16 %v2191_v20 }
  0xba   : > { %v2186_v27 = vpop.permute.xlu0 %2185  ;;  %2480 = vrot.lane.b32.xlu1 %v3360_v45, %s2788_s6 }
  0xbb   : > { %v3504_v62 = vsel %vm1277_vm4, %v1256_v53, %v2193_v47  ;;  %v3507_v54 = vsel %vm1277_vm4, %v1255_v3, %v2192_v0  ;;  %v2188_v39 = vunpack.i.h.bf16 %v2186_v27  ;;  %v2187_v20 = vunpack.i.l.bf16 %v2186_v27 }
  0xbc   : > { %2475 = vrot.lane.b32.xlu0 %v3319_v8, %s2788_s6  ;;  %v2201_v45 = vpop.permute.xlu1 %2200  ;;  %v1258_v3 = vsel %vm1244_vm3, %v2971_v50, %v2118_v12  ;;  %v4446_v50 = vld [vmem:[#allocation10_spill] sm:$0xff] }
  0xbd   : > { %v3518_v61 = vsel %vm1277_vm4, %v1253_v24, %v2187_v20  ;;  %v3521_v47 = vsel %vm1277_vm4, %v1254_v25, %v2188_v39  ;;  %v2203_v27 = vunpack.i.h.bf16 %v2201_v45  ;;  %v2202_v0 = vunpack.i.l.bf16 %v2201_v45 }
  0xbe   : > { %v2196_v14 = vpop.permute.xlu0 %2195  ;;  %2490 = vrot.lane.b32.xlu1 %v3142_v58, %s2789_s11  ;;  %v2152_v39 = vunpack.i.l.bf16 %v3465_v37  ;;  %v2148_v25 = vunpack.i.h.bf16 %v3467_v35  ;;  %v2147_v24 = vunpack.i.l.bf16 %v3467_v35 }
  0xbf   : > { %v3530_v8 = vsel %vm1277_vm4, %v1260_v36, %v2203_v27  ;;  %v3533_v32 = vsel %vm1277_vm4, %v1259_v31, %v2202_v0  ;;  %v2198_v15 = vunpack.i.h.bf16 %v2196_v14  ;;  %v2197_v53 = vunpack.i.l.bf16 %v2196_v14 }
  0xc0   : > { %2485 = vrot.lane.b32.xlu0 %v4444_v48, %s2789_s11  ;;  %v3541_v42 = vpop.permute.xlu1 %2210  ;;  %v2153_v48 = vunpack.i.h.bf16 %v3465_v37  ;;  %v1271_v37 = vsel %vm1244_vm3, %v3057_v60, %v2152_v39  ;;  %v2163_v0 = vunpack.i.h.bf16 %v3473_v7  ;;  %v1269_v60 = vsel %vm1244_vm3, %v4430_v52, %v2147_v24 }
  0xc1   : > { %v3544_v58 = vsel %vm1277_vm4, %v1257_v43, %v2197_v53  ;;  %v3547_v13 = vsel %vm1277_vm4, %v1258_v3, %v2198_v15  ;;  %v2157_v15 = vunpack.i.l.bf16 %v3475_v46 }
  0xc2   : > { %v3549_v55 = vpop.permute.xlu0 %2205  ;;  %2500 = vrot.lane.b32.xlu1 %v3132_v57, %s2789_s11  ;;  %v1272_v27 = vsel %vm1244_vm3, %v3060_v63, %v2153_v48  ;;  %v1270_v63 = vsel %vm1244_vm3, %v4431_v51, %v2148_v25  ;;  %v1276_v51 = vsel %vm1244_vm3, %v4434_v26, %v2163_v0 }
  0xc3   : > { %v1273_v26 = vsel %vm1244_vm3, %v3111_v4, %v2157_v15  ;;  %v2728_v15 = vld [vmem:[%s2870_s27 + $0x98] sm:$0xff] }
  0xc4   : > { %2495 = vrot.lane.b32.xlu0 %v4446_v50, %s2789_s11  ;;  %v3555_v49 = vpop.permute.xlu1 %2220 }
  0xc6   : > { %v3559_v20 = vpop.permute.xlu0 %2215  ;;  %2510 = vrot.lane.b32.xlu1 %v3270_v5, %s2790_s20  ;;  %v2162_v5 = vunpack.i.l.bf16 %v3473_v7  ;;  %v2158_v7 = vunpack.i.h.bf16 %v3475_v46 }
  0xc8   : > { %2505 = vrot.lane.b32.xlu0 %v3214_v28, %s2790_s20  ;;  %v2231_v12 = vpop.permute.xlu1 %2230  ;;  %v1275_v52 = vsel %vm1244_vm3, %v4433_v10, %v2162_v5 }
  0xc9   : > { %v2233_v18 = vunpack.i.h.bf16 %v2231_v12  ;;  %v2232_v45 = vunpack.i.l.bf16 %v2231_v12 }
  0xca   : > { %v2226_v36 = vpop.permute.xlu0 %2225  ;;  %2520 = vrot.lane.b32.xlu1 %v3267_v16, %s2790_s20 }
  0xcb   : > { %v3576_v35 = vsel %vm1277_vm4, %v1272_v27, %v2233_v18  ;;  %v3579_v28 = vsel %vm1277_vm4, %v1271_v37, %v2232_v45  ;;  %v2228_v31 = vunpack.i.h.bf16 %v2226_v36  ;;  %v2227_v14 = vunpack.i.l.bf16 %v2226_v36 }
  0xcc   : > { %2515 = vrot.lane.b32.xlu0 %v3197_v38, %s2790_s20  ;;  %v2241_v53 = vpop.permute.xlu1 %2240  ;;  %v1274_v45 = vsel %vm1244_vm3, %v3114_v22, %v2158_v7  ;;  %v4447_v22 = vld [vmem:[#allocation13_spill] sm:$0xff] }
  0xcd   : > { %v3590_v3 = vsel %vm1277_vm4, %v1269_v60, %v2227_v14  ;;  %v3593_v43 = vsel %vm1277_vm4, %v1270_v63, %v2228_v31  ;;  %v2243_v48 = vunpack.i.h.bf16 %v2241_v53  ;;  %v2242_v39 = vunpack.i.l.bf16 %v2241_v53  ;;  %v2727_v7 = vld [vmem:[%s2870_s27 + $0x90] sm:$0xff] }
  0xce   : > { %v2236_v25 = vpop.permute.xlu0 %2235  ;;  %2530 = vrot.lane.b32.xlu1 %v3132_v57, %s2786_s4  ;;  %v2564_v53 = vpack.i.bf16 %v2728_v15, %v2727_v7  ;;  %v4460_v15 = vld [vmem:[#allocation12_spill] sm:$0xff] }
  0xcf   : > { %v3602_v46 = vsel %vm1277_vm4, %v1276_v51, %v2243_v48  ;;  %v3605_v24 = vsel %vm1277_vm4, %v1275_v52, %v2242_v39  ;;  %v2238_v12 = vunpack.i.h.bf16 %v2236_v25  ;;  %v2237_v18 = vunpack.i.l.bf16 %v2236_v25  ;;  %v4452_v52 = vld [vmem:[#allocation17_spill] sm:$0xff] }
  0xd0   : > { %2525 = vrot.lane.b32.xlu0 %v4446_v50, %s2786_s4  ;;  %v3613_v10 = vpop.permute.xlu1 %2250 }
  0xd1   : > { %v3616_v57 = vsel %vm1277_vm4, %v1273_v26, %v2237_v18  ;;  %v3619_v27 = vsel %vm1277_vm4, %v1274_v45, %v2238_v12  ;;  %v2729_v45 = vld [vmem:[%s2870_s27 + $0xa8] sm:$0xff]  ;;  %v2730_v26 = vld [vmem:[%s2870_s27 + $0xb0] sm:$0xff] }
  0xd2   : > { %v3621_v37 = vpop.permute.xlu0 %2245  ;;  %2540 = vrot.lane.b32.xlu1 %v3160_v6, %s2786_s4 }
  0xd4   : > { %2535 = vrot.lane.b32.xlu0 %v4447_v22, %s2786_s4  ;;  %v3627_v4 = vpop.permute.xlu1 %2260 }
  0xd6   : > { %v3629_v50 = vpop.permute.xlu0 %2255  ;;  %2550 = vrot.lane.b32.xlu1 %v3267_v16, %s2787_s5 }
  0xd8   : > { %2545 = vrot.lane.b32.xlu0 %v3197_v38, %s2787_s5  ;;  %v2271_v0 = vpop.permute.xlu1 %2270 }
  0xd9   : > { %v2273_v5 = vunpack.i.h.bf16 %v2271_v0  ;;  %v2272_v36 = vunpack.i.l.bf16 %v2271_v0  ;;  %v2574_v0 = vpack.i.bf16 %v2730_v26, %v2729_v45  ;;  %v3727_v45 = vld [vmem:[%s2870_s27 + $0x290] sm:$0xff]  ;;  %v3730_v26 = vld [vmem:[%s2870_s27 + $0x298] sm:$0x3] }
  0xda   : > { %v2266_v31 = vpop.permute.xlu0 %2265  ;;  %2560 = vrot.lane.b32.xlu1 %v3284_v59, %s2787_s5 }
  0xdb   : > { %v3639_v14 = vsel %vm1310_vm5, %v3507_v54, %v2272_v36  ;;  %v3643_v63 = vsel %vm1310_vm5, %v3504_v62, %v2273_v5  ;;  %v2268_v16 = vunpack.i.h.bf16 %v2266_v31  ;;  %v2267_v60 = vunpack.i.l.bf16 %v2266_v31 }
  0xdc   : > { %4448 = vst [vmem:[#allocation9_spill] sm:$0xff] %v3639_v14  ;;  %4449 = vst [vmem:[#allocation16_spill] sm:$0xff] %v3643_v63  ;;  %2555 = vrot.lane.b32.xlu0 %v3224_v9, %s2787_s5  ;;  %v2281_v38 = vpop.permute.xlu1 %2280  ;;  %v2732_v14 = vld [vmem:[%s2870_s27 + $0x30] sm:$0xff] }
  0xdd   : > { %v3651_v48 = vsel %vm1310_vm5, %v3518_v61, %v2267_v60  ;;  %v3655_v54 = vsel %vm1310_vm5, %v3521_v47, %v2268_v16  ;;  %v2283_v62 = vunpack.i.h.bf16 %v2281_v38  ;;  %v2282_v39 = vunpack.i.l.bf16 %v2281_v38  ;;  %v4457_v38 = vld [vmem:[#allocation20_spill] sm:$0xff] }
  0xde   : > { %4450 = vst [vmem:[#allocation8_spill] sm:$0xff] %v3651_v48  ;;  %4451 = vst [vmem:[#allocation11_spill] sm:$0xff] %v3655_v54  ;;  %v2276_v51 = vpop.permute.xlu0 %2275  ;;  %2570 = vrot.lane.b32.xlu1 %v4452_v52, %s2788_s6  ;;  %v3716_v52 = vld [vmem:[%s2870_s27 + $0x288] sm:$0xff] }
  0xdf   : > { %v3661_v25 = vsel %vm1310_vm5, %v3533_v32, %v2282_v39  ;;  %v3665_v12 = vsel %vm1310_vm5, %v3530_v8, %v2283_v62  ;;  %v2278_v61 = vunpack.i.h.bf16 %v2276_v51  ;;  %v2277_v18 = vunpack.i.l.bf16 %v2276_v51 }
  0xe0   : > { %4453 = vst [vmem:[#allocation10_spill] sm:$0xff] %v3661_v25  ;;  %4454 = vst [vmem:[#allocation13_spill] sm:$0xff] %v3665_v12  ;;  %2565 = vrot.lane.b32.xlu0 %v2564_v53, %s2788_s6  ;;  %v3668_v47 = vpop.permute.xlu1 %2290  ;;  %v2257_v25 = vunpack.i.l.bf16 %v3629_v50 }
  0xe1   : > { %v3674_v5 = vsel %vm1310_vm5, %v3544_v58, %v2277_v18  ;;  %v3678_v32 = vsel %vm1310_vm5, %v3547_v13, %v2278_v61 }
  0xe2   : > { %4455 = vst [vmem:[#allocation17_spill] sm:$0xff] %v3674_v5  ;;  %4456 = vst [vmem:[#allocation22_spill] sm:$0xff] %v3678_v32  ;;  %v3680_v36 = vpop.permute.xlu0 %2285  ;;  %2580 = vrot.lane.b32.xlu1 %v3372_v33, %s2788_s6 }
  0xe4   : > { %2575 = vrot.lane.b32.xlu0 %v2574_v0, %s2788_s6  ;;  %v3685_v8 = vpop.permute.xlu1 %2300  ;;  %v3733_v0 = vld [vmem:[%s2870_s27 + $0xe8] sm:$0x3] }
  0xe6   : > { %v3687_v31 = vpop.permute.xlu0 %2295  ;;  %2590 = vrot.lane.b32.xlu1 %v3160_v6, %s2789_s11 }
  0xe8   : > { %2585 = vrot.lane.b32.xlu0 %v4447_v22, %s2789_s11  ;;  %v2311_v58 = vpop.permute.xlu1 %2310 }
  0xe9   : > { %v2313_v13 = vunpack.i.h.bf16 %v2311_v58  ;;  %v2312_v16 = vunpack.i.l.bf16 %v2311_v58  ;;  %v1037_v58 = vrot.slane %v3716_v52, 1 }
  0xea   : > { %v2306_v60 = vpop.permute.xlu0 %2305  ;;  %2600 = vrot.lane.b32.xlu1 %v4457_v38, %s2789_s11 }
  0xeb   : > { %v3697_v33 = vsel %vm1310_vm5, %v3579_v28, %v2312_v16  ;;  %v3701_v7 = vsel %vm1310_vm5, %v3576_v35, %v2313_v13  ;;  %v2308_v6 = vunpack.i.h.bf16 %v2306_v60  ;;  %v2307_v22 = vunpack.i.l.bf16 %v2306_v60  ;;  %v3745_v13 = vld [vmem:[%s2870_s27 + $0xe0] sm:$0xff] }
  0xec   : > { %4458 = vst [vmem:[#allocation20_spill] sm:$0xff] %v3697_v33  ;;  %4459 = vst [vmem:[#allocation23_spill] sm:$0xff] %v3701_v7  ;;  %2595 = vrot.lane.b32.xlu0 %v4460_v15, %s2789_s11  ;;  %v2321_v53 = vpop.permute.xlu1 %2320  ;;  %v1139_v32 = vrot.slane %v3745_v13, 2 }
  0xed   : > { %v3707_v62 = vsel %vm1310_vm5, %v3590_v3, %v2307_v22  ;;  %v3711_v28 = vsel %vm1310_vm5, %v3593_v43, %v2308_v6  ;;  %v2323_v39 = vunpack.i.h.bf16 %v2321_v53  ;;  %v2322_v35 = vunpack.i.l.bf16 %v2321_v53 }
  0xee   : > { %4461 = vst [vmem:[#allocation12_spill] sm:$0xff] %v3711_v28  ;;  %v2316_v51 = vpop.permute.xlu0 %2315  ;;  %2610 = vrot.lane.b32.xlu1 %v3284_v59, %s2790_s20  ;;  %v2098_v22 = vunpack.i.h.bf16 %v3417_v2  ;;  %v2097_v53 = vunpack.i.l.bf16 %v3417_v2  ;;  %v4467_v2 = vld [vmem:[#allocation21_spill] sm:$0xff] }
  0xef   : > { %v3720_v61 = vsel %vm1310_vm5, %v3605_v24, %v2322_v35  ;;  %v3724_v3 = vsel %vm1310_vm5, %v3602_v46, %v2323_v39  ;;  %v2318_v43 = vunpack.i.h.bf16 %v2316_v51  ;;  %v2317_v18 = vunpack.i.l.bf16 %v2316_v51  ;;  %v3742_v46 = vld [vmem:[%s2870_s27 + $0xd8] sm:$0xff] }
  0xf0   : > { %4462 = vst [vmem:[#allocation24_spill] sm:$0xff] %v3720_v61  ;;  %4463 = vst [vmem:[#allocation25_spill] sm:$0xff] %v3724_v3  ;;  %2605 = vrot.lane.b32.xlu0 %v3224_v9, %s2790_s20  ;;  %v3737_v59 = vpop.permute.xlu1 %2330  ;;  %v1038_v24 = vrot.slane %v3727_v45, 1  ;;  %v1033_v9 = vrot.slane %v3745_v13, 1  ;;  %v1032_v6 = vrot.slane %v3742_v46, 1  ;;  %v4466_v35 = vld [vmem:[#allocation14_spill] sm:$0xff]  ;;  %v2178_v51 = vunpack.i.h.bf16 %v3491_v34 }
  0xf1   : > { %v3749_v16 = vsel %vm1310_vm5, %v3616_v57, %v2317_v18  ;;  %v3753_v60 = vsel %vm1310_vm5, %v3619_v27, %v2318_v43  ;;  %v1040_v57 = vrot.slane %v3730_v26, 1  ;;  %v1035_v27 = vrot.slane %v3733_v0, 1 }
  0xf2   : > { %4464 = vst [vmem:[#allocation26_spill] sm:$0xff] %v3749_v16  ;;  %4465 = vst [vmem:[#allocation27_spill] sm:$0xff] %v3753_v60  ;;  %v3759_v39 = vpop.permute.xlu0 %2325  ;;  %2620 = vrot.lane.b32.xlu1 %v4466_v35, %s2790_s20  ;;  %v2177_v43 = vunpack.i.l.bf16 %v3491_v34  ;;  %v2258_v18 = vunpack.i.h.bf16 %v3629_v50  ;;  %v1144_v3 = vrot.slane %v3727_v45, 2  ;;  %v1143_v61 = vrot.slane %v3716_v52, 2  ;;  %v2731_v50 = vld [vmem:[%s2870_s27 + $0x38] sm:$0xff] }
  0xf3   : > { %v1138_v5 = vrot.slane %v3742_v46, 2  ;;  %v3778_v60 = vsel %vm262_vm0, %v1037_v58, %v1038_v24  ;;  %v3781_v34 = vsel %vm262_vm0, %v1032_v6, %v1033_v9  ;;  %v1250_v16 = vsel %vm1244_vm3, %v2731_v50, %v2098_v22 }
  0xf4   : > { %2615 = vrot.lane.b32.xlu0 %v4467_v2, %s2790_s20  ;;  %v3771_v12 = vpop.permute.xlu1 %2340  ;;  %v1249_v63 = vsel %vm1244_vm3, %v2732_v14, %v2097_v53  ;;  %v3790_v33 = vsel %vm262_vm0, %v1038_v24, %v1040_v57  ;;  %v3793_v54 = vsel %vm262_vm0, %v1033_v9, %v1035_v27  ;;  %v1283_v58 = vsel %vm1277_vm4, %v1250_v16, %v2178_v51 }
  0xf5   : > { %v1282_v6 = vsel %vm1277_vm4, %v1249_v63, %v2177_v43  ;;  %v1316_v14 = vsel %vm1310_vm5, %v1283_v58, %v2258_v18  ;;  %v1146_v24 = vrot.slane %v3730_v26, 2  ;;  %v1141_v9 = vrot.slane %v3733_v0, 2  ;;  %v2733_v58 = vld [vmem:[%s2870_s27 + $0x8] sm:$0xff]  ;;  %v2740_v26 = vld [vmem:[%s2870_s27 + $0x1b0] sm:$0xff] }
  0xf6   : > { %v2336_v7 = vpop.permute.xlu0 %2335  ;;  %2630 = vrot.lane.b32.xlu1 %v4457_v38, %s2786_s4  ;;  %v1315_v22 = vsel %vm1310_vm5, %v1282_v6, %v2257_v25  ;;  %v2088_v53 = vunpack.i.h.bf16 %v3419_v11  ;;  %v2087_v16 = vunpack.i.l.bf16 %v3419_v11  ;;  %v3829_v0 = vsel %vm439_vm1, %v1143_v61, %v1144_v3  ;;  %v2734_v6 = vld [vmem:[%s2870_s27] sm:$0xff] }
  0xf7   : > { %v2338_v48 = vunpack.i.h.bf16 %v2336_v7  ;;  %v2337_v28 = vunpack.i.l.bf16 %v2336_v7  ;;  %v2093_v7 = vunpack.i.h.bf16 %v3430_v56  ;;  %v2132_v27 = vunpack.i.l.bf16 %v3449_v40 }
  0xf8   : > { %2625 = vrot.lane.b32.xlu0 %v4460_v15, %s2786_s4  ;;  %v3801_v38 = vpop.permute.xlu1 %2350  ;;  %v2092_v15 = vunpack.i.l.bf16 %v3430_v56  ;;  %v3837_v43 = vsel %vm439_vm1, %v1144_v3, %v1146_v24  ;;  %v3840_v18 = vsel %vm439_vm1, %v1138_v5, %v1139_v32  ;;  %v3843_v50 = vsel %vm439_vm1, %v1139_v32, %v1141_v9  ;;  %v2735_v3 = vld [vmem:[%s2870_s27 + $0x20] sm:$0xff]  ;;  %v2736_v5 = vld [vmem:[%s2870_s27 + $0x18] sm:$0xff] }
  0xf9   : > { %v3808_v63 = vsel %vm1343_vm6, %v1315_v22, %v2337_v28  ;;  %v3811_v25 = vsel %vm1343_vm6, %v1316_v14, %v2338_v48  ;;  %v2133_v48 = vunpack.i.h.bf16 %v3449_v40  ;;  %v1246_v61 = vsel %vm1244_vm3, %v2733_v58, %v2088_v53 }
  0xfa   : > { %v3815_v57 = vpop.permute.xlu0 %2345  ;;  %2640 = vrot.lane.b32.xlu1 %v3379_v1, %s2786_s4  ;;  %v1245_v40 = vsel %vm1244_vm3, %v2734_v6, %v2087_v16  ;;  %v2128_v22 = vunpack.i.h.bf16 %v3451_v29  ;;  %v2127_v14 = vunpack.i.l.bf16 %v3451_v29  ;;  %v1248_v24 = vsel %vm1244_vm3, %v2735_v3, %v2093_v7  ;;  %v2737_v16 = vld [vmem:[%s2870_s27 + $0x1d0] sm:$0xff]  ;;  %v2738_v6 = vld [vmem:[%s2870_s27 + $0x1c8] sm:$0xff] }
  0xfb   : > { %v1247_v56 = vsel %vm1244_vm3, %v2736_v5, %v2092_v15  ;;  %v2173_v32 = vunpack.i.h.bf16 %v3481_v19  ;;  %v2172_v9 = vunpack.i.l.bf16 %v3481_v19  ;;  %v1264_v29 = vsel %vm1244_vm3, %v2737_v16, %v2133_v48  ;;  %v2739_v16 = vld [vmem:[%s2870_s27 + $0x1b8] sm:$0xff] }
  0xfc   : > { %2635 = vrot.lane.b32.xlu0 %v3382_v30, %s2786_s4  ;;  %v3834_v51 = vpop.permute.xlu1 %2360  ;;  %v2167_v58 = vunpack.i.l.bf16 %v3483_v44  ;;  %v1263_v19 = vsel %vm1244_vm3, %v2738_v6, %v2132_v27  ;;  %v2168_v3 = vunpack.i.h.bf16 %v3483_v44  ;;  %v2213_v5 = vunpack.i.h.bf16 %v3541_v42 }
  0xfd   : > { %v1262_v7 = vsel %vm1244_vm3, %v2739_v16, %v2128_v22  ;;  %v1261_v15 = vsel %vm1244_vm3, %v2740_v26, %v2127_v14  ;;  %v2208_v28 = vunpack.i.h.bf16 %v3549_v55  ;;  %v2207_v27 = vunpack.i.l.bf16 %v3549_v55 }
  0xfe   : > { %v3857_v53 = vpop.permute.xlu0 %2355  ;;  %2650 = vrot.lane.b32.xlu1 %v4466_v35, %s2787_s5  ;;  %v2212_v35 = vunpack.i.l.bf16 %v3541_v42  ;;  %v1280_v44 = vsel %vm1277_vm4, %v1247_v56, %v2172_v9  ;;  %v1281_v6 = vsel %vm1277_vm4, %v1248_v24, %v2173_v32  ;;  %v2253_v42 = vunpack.i.h.bf16 %v3613_v10 }
  0xff   : > { %v1278_v26 = vsel %vm1277_vm4, %v1245_v40, %v2167_v58  ;;  %v2248_v22 = vunpack.i.h.bf16 %v3621_v37  ;;  %v2247_v55 = vunpack.i.l.bf16 %v3621_v37  ;;  %v2292_v56 = vunpack.i.l.bf16 %v3668_v47 }
 0x100   : > { %2645 = vrot.lane.b32.xlu0 %v4467_v2, %s2787_s5  ;;  %v3875_v48 = vpop.permute.xlu1 %2370  ;;  %v2252_v2 = vunpack.i.l.bf16 %v3613_v10  ;;  %v1279_v14 = vsel %vm1277_vm4, %v1246_v61, %v2168_v3  ;;  %v1297_v24 = vsel %vm1277_vm4, %v1264_v29, %v2213_v5  ;;  %v1296_v10 = vsel %vm1277_vm4, %v1263_v19, %v2212_v35 }
 0x101   : > { %v2293_v32 = vunpack.i.h.bf16 %v3668_v47  ;;  %v1294_v40 = vsel %vm1277_vm4, %v1261_v15, %v2207_v27  ;;  %v1295_v37 = vsel %vm1277_vm4, %v1262_v7, %v2208_v28  ;;  %v2288_v58 = vunpack.i.h.bf16 %v3680_v36 }
 0x102   : > { %v3887_v11 = vpop.permute.xlu0 %2365  ;;  %2660 = vrot.lane.b32.xlu1 %v3395_v17, %s2787_s5  ;;  %v2287_v61 = vunpack.i.l.bf16 %v3680_v36  ;;  %v1313_v29 = vsel %vm1310_vm5, %v1280_v44, %v2252_v2  ;;  %v1314_v19 = vsel %vm1310_vm5, %v1281_v6, %v2253_v42  ;;  %v2333_v47 = vunpack.i.h.bf16 %v3737_v59 }
 0x103   : > { %v2332_v3 = vunpack.i.l.bf16 %v3737_v59  ;;  %v1311_v28 = vsel %vm1310_vm5, %v1278_v26, %v2247_v55  ;;  %v1312_v7 = vsel %vm1310_vm5, %v1279_v14, %v2248_v22  ;;  %v3918_v36 = vsel %vm1310_vm5, %v1296_v10, %v2292_v56 }
 0x104   : > { %2655 = vrot.lane.b32.xlu0 %v3398_v41, %s2787_s5  ;;  %v3901_v9 = vpop.permute.xlu1 %2380  ;;  %v2327_v15 = vunpack.i.l.bf16 %v3759_v39  ;;  %v3922_v35 = vsel %vm1310_vm5, %v1297_v24, %v2293_v32  ;;  %v2328_v59 = vunpack.i.h.bf16 %v3759_v39  ;;  %v2343_v16 = vunpack.i.h.bf16 %v3771_v12 }
 0x105   : > { %v2342_v27 = vunpack.i.l.bf16 %v3771_v12  ;;  %v1327_v6 = vsel %vm1310_vm5, %v1294_v40, %v2287_v61  ;;  %v1328_v42 = vsel %vm1310_vm5, %v1295_v37, %v2288_v58  ;;  %v2353_v2 = vunpack.i.h.bf16 %v3801_v38 }
 0x106   : > { %v3911_v5 = vpop.permute.xlu0 %2375  ;;  %2670 = vrot.lane.b32.xlu1 %v3364_v21, %s2788_s6  ;;  %v4468_v21 = vld [vmem:[#allocation15_spill] sm:$0xff]  ;;  %v2352_v26 = vunpack.i.l.bf16 %v3801_v38  ;;  %v1346_v22 = vsel %vm1343_vm6, %v1313_v29, %v2332_v3  ;;  %v1347_v39 = vsel %vm1343_vm6, %v1314_v19, %v2333_v47  ;;  %v2363_v55 = vunpack.i.h.bf16 %v3834_v51 }
 0x107   : > { %v2362_v12 = vunpack.i.l.bf16 %v3834_v51  ;;  %v4469_v14 = vpack.i.bf16 %v3727_v45, %v3716_v52  ;;  %v1344_v24 = vsel %vm1343_vm6, %v1311_v28, %v2327_v15  ;;  %v2358_v10 = vunpack.i.h.bf16 %v3857_v53 }
 0x108   : > { %2665 = vrot.lane.b32.xlu0 %v4468_v21, %s2788_s6  ;;  %v2391_v44 = vpop.permute.xlu1 %2390  ;;  %v2357_v38 = vunpack.i.l.bf16 %v3857_v53  ;;  %v2372_v32 = vunpack.i.l.bf16 %v3875_v48  ;;  %v1345_v40 = vsel %vm1343_vm6, %v1312_v7, %v2328_v59  ;;  %v1360_v51 = vsel %vm1343_vm6, %v1327_v6, %v2342_v27 }
 0x109   : > { %v1361_v37 = vsel %vm1343_vm6, %v1328_v42, %v2343_v16  ;;  %v2373_v58 = vunpack.i.h.bf16 %v3875_v48  ;;  %v4470_v52 = vpack.i.bf16 %v3745_v13, %v3742_v46  ;;  %v1377_v61 = vsel %vm1376_vm7, %v1344_v24, %v2352_v26 }
 0x10a   : > { %v3937_v56 = vpop.permute.xlu0 %2385  ;;  %2680 = vrot.lane.b32.xlu1 %v4469_v14, %s2788_s6  ;;  %v1378_v53 = vsel %vm1376_vm7, %v1345_v40, %v2353_v2  ;;  %v2348_v29 = vunpack.i.h.bf16 %v3815_v57  ;;  %v2392_v19 = vunpack.i.l.bf16 %v2391_v44  ;;  %v2347_v47 = vunpack.i.l.bf16 %v3815_v57 }
 0x10b   : > { %v1379_v3 = vsel %vm1376_vm7, %v1346_v22, %v2362_v12  ;;  %v1380_v28 = vsel %vm1376_vm7, %v1347_v39, %v2363_v55  ;;  %v2393_v48 = vunpack.i.h.bf16 %v2391_v44  ;;  %v1393_v46 = vsel %vm1376_vm7, %v1360_v51, %v2357_v38 }
 0x10c   : > { %2675 = vrot.lane.b32.xlu0 %v4470_v52, %s2788_s6  ;;  %v2401_v45 = vpop.permute.xlu1 %2400  ;;  %v1394_v13 = vsel %vm1376_vm7, %v1361_v37, %v2358_v10  ;;  %v1410_v15 = vsel %vm1409_vm8, %v1377_v61, %v2372_v32  ;;  %v2382_v59 = vunpack.i.l.bf16 %v3901_v9  ;;  %v1411_v16 = vsel %vm1409_vm8, %v1378_v53, %v2373_v58 }
 0x10d   : > { %v2368_v57 = vunpack.i.h.bf16 %v3887_v11  ;;  %v2383_v27 = vunpack.i.h.bf16 %v3901_v9  ;;  %v2377_v21 = vunpack.i.l.bf16 %v3911_v5  ;;  %v2378_v44 = vunpack.i.h.bf16 %v3911_v5 }
 0x10e   : > { %v2396_v7 = vpop.permute.xlu0 %2395  ;;  %2690 = vrot.lane.b32.xlu1 %v3379_v1, %s2789_s11  ;;  %v1443_v2 = vsel %vm1442_vm9, %v1410_v15, %v2392_v19  ;;  %v2403_v26 = vunpack.i.h.bf16 %v2401_v45  ;;  %v2402_v22 = vunpack.i.l.bf16 %v2401_v45  ;;  %v4471_v9 = vpack.i.bf16 %v3790_v33, %v3778_v60 }
 0x10f   : > { %v2397_v39 = vunpack.i.l.bf16 %v2396_v7  ;;  %v1444_v12 = vsel %vm1442_vm9, %v1411_v16, %v2393_v48  ;;  %v1412_v14 = vsel %vm1409_vm8, %v1379_v3, %v2382_v59  ;;  %v1413_v10 = vsel %vm1409_vm8, %v1380_v28, %v2383_v27 }
 0x110   : > { %2685 = vrot.lane.b32.xlu0 %v3382_v30, %s2789_s11  ;;  %v2411_v1 = vpop.permute.xlu1 %2410  ;;  %v2367_v30 = vunpack.i.l.bf16 %v3887_v11  ;;  %v1426_v38 = vsel %vm1409_vm8, %v1393_v46, %v2377_v21  ;;  %v2398_v32 = vunpack.i.h.bf16 %v2396_v7  ;;  %v4472_v33 = vpack.i.bf16 %v3793_v54, %v3781_v34 }
 0x111   : > { %v2413_v6 = vunpack.i.h.bf16 %v2411_v1  ;;  %v2412_v42 = vunpack.i.l.bf16 %v2411_v1  ;;  %v1427_v11 = vsel %vm1409_vm8, %v1394_v13, %v2378_v44  ;;  %v2388_v51 = vunpack.i.h.bf16 %v3937_v56 }
 0x112   : > { %v2406_v55 = vpop.permute.xlu0 %2405  ;;  %2700 = vrot.lane.b32.xlu1 %v4471_v9, %s2789_s11  ;;  %v2387_v52 = vunpack.i.l.bf16 %v3937_v56  ;;  %v1445_v45 = vsel %vm1442_vm9, %v1412_v14, %v2402_v22  ;;  %v1446_v61 = vsel %vm1442_vm9, %v1413_v10, %v2403_v26  ;;  %v1459_v54 = vsel %vm1442_vm9, %v1426_v38, %v2397_v39  ;;  %v4475_v9 = vld [vmem:[#allocation18_spill] sm:$0xff]  ;;  %v4476_v14 = vld [vmem:[#allocation19_spill] sm:$0xff] }
 0x113   : > { %v1476_v5 = vsel %vm1475_vm10, %v1443_v2, %v2412_v42  ;;  %v1477_v24 = vsel %vm1475_vm10, %v1444_v12, %v2413_v6  ;;  %v2408_v48 = vunpack.i.h.bf16 %v2406_v55  ;;  %v2407_v56 = vunpack.i.l.bf16 %v2406_v55  ;;  %v4477_v38 = vld [vmem:[#allocation7_spill] sm:$0xff] }
 0x114   : > { %2695 = vrot.lane.b32.xlu0 %v4472_v33, %s2789_s11  ;;  %v2421_v60 = vpop.permute.xlu1 %2420  ;;  %v1508_v40 = vpack.c.bf16 %v1477_v24, %v1476_v5  ;;  %v1363_v13 = vsel %vm1343_vm6, %v3922_v35, %v2348_v29  ;;  %v1362_v15 = vsel %vm1343_vm6, %v3918_v36, %v2347_v47  ;;  %v2143_v12 = vunpack.i.h.bf16 %v4475_v9 }
 0x115   : > { %v2423_v37 = vunpack.i.h.bf16 %v2421_v60  ;;  %v2422_v58 = vunpack.i.l.bf16 %v2421_v60  ;;  %v1395_v27 = vsel %vm1376_vm7, %v1362_v15, %v2367_v30  ;;  %v1396_v21 = vsel %vm1376_vm7, %v1363_v13, %v2368_v57 }
 0x116   : > { %v2416_v53 = vpop.permute.xlu0 %2415  ;;  %2710 = vrot.lane.b32.xlu1 %v3395_v17, %s2790_s20  ;;  %1984 = vmatprep.mubr.msk.bf16.mxu0 %vm1551_vm11, %v1508_v40  ;;  %v1460_v17 = vsel %vm1442_vm9, %v1427_v11, %v2398_v32  ;;  %v1428_v29 = vsel %vm1409_vm8, %v1395_v27, %v2387_v52  ;;  %v1429_v36 = vsel %vm1409_vm8, %v1396_v21, %v2388_v51  ;;  %v2142_v30 = vunpack.i.l.bf16 %v4475_v9  ;;  %v2741_v11 = vld [vmem:[%s2870_s27 + $0x50] sm:$0xff]  ;;  %v2743_v52 = vld [vmem:[%s2870_s27 + $0x200] sm:$0xff] }
 0x117   : > { %v1478_v34 = vsel %vm1475_vm10, %v1445_v45, %v2422_v58  ;;  %v1479_v19 = vsel %vm1475_vm10, %v1446_v61, %v2423_v37  ;;  %v2418_v3 = vunpack.i.h.bf16 %v2416_v53  ;;  %v2417_v28 = vunpack.i.l.bf16 %v2416_v53  ;;  %v2742_v37 = vld [vmem:[%s2870_s27 + $0x48] sm:$0xff]  ;;  %v2744_v61 = vld [vmem:[%s2870_s27 + $0x1f8] sm:$0xff] }
 0x118   : > { %v1509_v7 = vpack.c.bf16 %v1479_v19, %v1478_v34  ;;  %2705 = vrot.lane.b32.xlu0 %v3398_v41, %s2790_s20  ;;  %v4003_v46 = vpop.permute.xlu1 %2430  ;;  %v4473_v41 = vpack.i.bf16 %v3837_v43, %v3829_v0  ;;  %v1461_v6 = vsel %vm1442_vm9, %v1428_v29, %v2407_v56  ;;  %v1462_v42 = vsel %vm1442_vm9, %v1429_v36, %v2408_v48  ;;  %v2746_v19 = vld [vmem:[%s2870_s27 + $0x1e0] sm:$0xff] }
 0x119   : > { %v1492_v59 = vsel %vm1475_vm10, %v1459_v54, %v2417_v28  ;;  %v1493_v16 = vsel %vm1475_vm10, %v1460_v17, %v2418_v3  ;;  %v4474_v57 = vpack.i.bf16 %v3843_v50, %v3840_v18  ;;  %v2103_v18 = vunpack.i.h.bf16 %v3428_v23  ;;  %v2745_v54 = vld [vmem:[%s2870_s27 + $0x1e8] sm:$0xff]  ;;  %s1928_s27 = sshll.u32 %s146_s24, 8 }
 0x11a   : > { %v2426_v1 = vpop.permute.xlu0 %2425  ;;  %2720 = vrot.lane.b32.xlu1 %v4473_v41, %s2790_s20  ;;  %1985 = vmatmul.mubr.msk.bf16.vlgmr.msra.gmra.mrb[0].mxu0 %vm1551_vm11, %v1509_v7  ;;  %v1516_v35 = vpack.c.bf16 %v1493_v16, %v1492_v59  ;;  %v2102_v50 = vunpack.i.l.bf16 %v3428_v23  ;;  %v2138_v5 = vunpack.i.h.bf16 %v4476_v14  ;;  %v2137_v24 = vunpack.i.l.bf16 %v4476_v14  ;;  %s4275_s28 = scalar_lea.vmem [#allocation2], %s1928_s27 }
 0x11b   : > { %v2428_v47 = vunpack.i.h.bf16 %v2426_v1  ;;  %v2427_v44 = vunpack.i.l.bf16 %v2426_v1  ;;  %v2183_v32 = vunpack.i.h.bf16 %v4477_v38  ;;  %v2182_v33 = vunpack.i.l.bf16 %v4477_v38 }
 0x11c   : > { %2715 = vrot.lane.b32.xlu0 %v4474_v57, %s2790_s20  ;;  %2000 = vmatprep.mubr.msk.bf16.mxu1 %vm1551_vm11, %v1516_v35  ;;  %v4028_v0 = vpop.permute.xlu1 %2440  ;;  %v2223_v60 = vunpack.i.h.bf16 %v3555_v49  ;;  %v2222_v23 = vunpack.i.l.bf16 %v3555_v49  ;;  %v1252_v51 = vsel %vm1244_vm3, %v2741_v11, %v2103_v18  ;;  %v1251_v58 = vsel %vm1244_vm3, %v2742_v37, %v2102_v50 }
 0x11d   : > { %v1494_v43 = vsel %vm1475_vm10, %v1461_v6, %v2427_v44  ;;  %v1495_v2 = vsel %vm1475_vm10, %v1462_v42, %v2428_v47  ;;  %v1268_v45 = vsel %vm1244_vm3, %v2743_v52, %v2143_v12  ;;  %v1267_v53 = vsel %vm1244_vm3, %v2744_v61, %v2142_v30 }
 0x11e   : > { %v1517_v26 = vpack.c.bf16 %v1495_v2, %v1494_v43  ;;  %v4032_v22 = vpop.permute.xlu0 %2435  ;;  %v1266_v34 = vsel %vm1244_vm3, %v2745_v54, %v2138_v5  ;;  %v1265_v49 = vsel %vm1244_vm3, %v2746_v19, %v2137_v24  ;;  %v2218_v3 = vunpack.i.h.bf16 %v3559_v20 }
 0x11f   : > { %v2217_v28 = vunpack.i.l.bf16 %v3559_v20  ;;  %v1285_v56 = vsel %vm1277_vm4, %v1252_v51, %v2183_v32  ;;  %v1284_v7 = vsel %vm1277_vm4, %v1251_v58, %v2182_v33  ;;  %v2263_v17 = vunpack.i.h.bf16 %v3627_v4 }
 0x120   : > { %2001 = vmatmul.mubr.msk.bf16.vlgmr.msra.gmra.mrb[0].mxu1 %vm1551_vm11, %v1517_v26  ;;  %v4035_v39 = vpop.permute.xlu1 %2450  ;;  %v2262_v13 = vunpack.i.l.bf16 %v3627_v4  ;;  %v1301_v15 = vsel %vm1277_vm4, %v1268_v45, %v2223_v60  ;;  %v1300_v59 = vsel %vm1277_vm4, %v1267_v53, %v2222_v23  ;;  %v2298_v16 = vunpack.i.h.bf16 %v3687_v31 }
 0x121   : > { %v2297_v27 = vunpack.i.l.bf16 %v3687_v31  ;;  %v2303_v20 = vunpack.i.h.bf16 %v3685_v8  ;;  %v2302_v1 = vunpack.i.l.bf16 %v3685_v8  ;;  %v2433_v41 = vunpack.i.h.bf16 %v4003_v46 }
 0x122   : > { %v4037_v55 = vpop.permute.xlu0 %2445  ;;  %v2432_v35 = vunpack.i.l.bf16 %v4003_v46  ;;  %v1298_v29 = vsel %vm1277_vm4, %v1265_v49, %v2217_v28  ;;  %v1299_v4 = vsel %vm1277_vm4, %v1266_v34, %v2218_v3  ;;  %v2443_v36 = vunpack.i.h.bf16 %v4028_v0 }
 0x123   : > { %v2442_v47 = vunpack.i.l.bf16 %v4028_v0  ;;  %v1317_v31 = vsel %vm1310_vm5, %v1284_v7, %v2262_v13  ;;  %v1318_v6 = vsel %vm1310_vm5, %v1285_v56, %v2263_v17  ;;  %v2438_v42 = vunpack.i.h.bf16 %v4032_v22 }
 0x124   : > { %v4045_v10 = vpop.permute.xlu1 %2460  ;;  %v2437_v8 = vunpack.i.l.bf16 %v4032_v22  ;;  %v1331_v57 = vsel %vm1310_vm5, %v1298_v29, %v2297_v27  ;;  %v1332_v46 = vsel %vm1310_vm5, %v1299_v4, %v2298_v16  ;;  %v2453_v43 = vunpack.i.h.bf16 %v4035_v39 }
 0x125   : > { %v2452_v2 = vunpack.i.l.bf16 %v4035_v39  ;;  %v1333_v0 = vsel %vm1310_vm5, %v1300_v59, %v2302_v1  ;;  %v1334_v18 = vsel %vm1310_vm5, %v1301_v15, %v2303_v20  ;;  %v1364_v50 = vsel %vm1343_vm6, %v1331_v57, %v2432_v35 }
 0x126   : > { %v4051_v40 = vpop.permute.xlu0 %2455  ;;  %v1365_v9 = vsel %vm1343_vm6, %v1332_v46, %v2433_v41  ;;  %v1366_v22 = vsel %vm1343_vm6, %v1333_v0, %v2442_v47  ;;  %v1367_v12 = vsel %vm1343_vm6, %v1334_v18, %v2443_v36  ;;  %v2448_v30 = vunpack.i.h.bf16 %v4037_v55 }
 0x127   : > { %v2447_v14 = vunpack.i.l.bf16 %v4037_v55  ;;  %v1351_v39 = vsel %vm1343_vm6, %v1318_v6, %v2438_v42  ;;  %v1350_v24 = vsel %vm1343_vm6, %v1317_v31, %v2437_v8  ;;  %v2463_v38 = vunpack.i.h.bf16 %v4045_v10 }
 0x128   : > { %v4067_v48 = vpop.permute.xlu1 %2470  ;;  %v2462_v32 = vunpack.i.l.bf16 %v4045_v10  ;;  %v1397_v33 = vsel %vm1376_vm7, %v1364_v50, %v2452_v2  ;;  %v1398_v60 = vsel %vm1376_vm7, %v1365_v9, %v2453_v43  ;;  %v2458_v23 = vunpack.i.h.bf16 %v4051_v40 }
 0x129   : > { %v2457_v11 = vunpack.i.l.bf16 %v4051_v40  ;;  %v2473_v55 = vunpack.i.h.bf16 %v4067_v48  ;;  %v2472_v37 = vunpack.i.l.bf16 %v4067_v48  ;;  %v1381_v45 = vsel %vm1376_vm7, %v3808_v63, %v2447_v14 }
 0x12a   : > { %v2466_v21 = vpop.permute.xlu0 %2465  ;;  %v1382_v10 = vsel %vm1376_vm7, %v3811_v25, %v2448_v30  ;;  %v1399_v34 = vsel %vm1376_vm7, %v1366_v22, %v2462_v32  ;;  %v1400_v40 = vsel %vm1376_vm7, %v1367_v12, %v2463_v38  ;;  %v1384_v28 = vsel %vm1376_vm7, %v1351_v39, %v2458_v23 }
 0x12b   : > { %v2468_v58 = vunpack.i.h.bf16 %v2466_v21  ;;  %v2467_v52 = vunpack.i.l.bf16 %v2466_v21  ;;  %v1383_v3 = vsel %vm1376_vm7, %v1350_v24, %v2457_v11  ;;  %v1430_v7 = vsel %vm1409_vm8, %v1397_v33, %v2472_v37 }
 0x12c   : > { %v2481_v44 = vpop.permute.xlu1 %2480  ;;  %v1431_v25 = vsel %vm1409_vm8, %v1398_v60, %v2473_v55 }
 0x12d   : > { %v2483_v61 = vunpack.i.h.bf16 %v2481_v44  ;;  %v2482_v53 = vunpack.i.l.bf16 %v2481_v44  ;;  %v1414_v17 = vsel %vm1409_vm8, %v1381_v45, %v2467_v52  ;;  %v1415_v13 = vsel %vm1409_vm8, %v1382_v10, %v2468_v58 }
 0x12e   : > { %v4093_v26 = vpop.permute.xlu0 %2475 }
 0x12f   : > { %v2477_v19 = vunpack.i.l.bf16 %v4093_v26  ;;  %v1432_v15 = vsel %vm1409_vm8, %v1399_v34, %v2482_v53  ;;  %v1433_v59 = vsel %vm1409_vm8, %v1400_v40, %v2483_v61  ;;  %v2478_v16 = vunpack.i.h.bf16 %v4093_v26 }
 0x130   : > { %v2491_v5 = vpop.permute.xlu1 %2490 }
 0x131   : > { %v2492_v49 = vunpack.i.l.bf16 %v2491_v5  ;;  %v2493_v48 = vunpack.i.h.bf16 %v2491_v5  ;;  %v1416_v20 = vsel %vm1409_vm8, %v1383_v3, %v2477_v19  ;;  %v1417_v22 = vsel %vm1409_vm8, %v1384_v28, %v2478_v16  ;;  %v4478_v16 = vld [vmem:[#allocation12_spill] sm:$0xff] }
 0x132   : > { %v2486_v51 = vpop.permute.xlu0 %2485 }
 0x133   : > { %v2487_v56 = vunpack.i.l.bf16 %v2486_v51  ;;  %v2488_v27 = vunpack.i.h.bf16 %v2486_v51  ;;  %v1463_v1 = vsel %vm1442_vm9, %v1430_v7, %v2492_v49  ;;  %v1464_v29 = vsel %vm1442_vm9, %v1431_v25, %v2493_v48 }
 0x134   : > { %v2501_v54 = vpop.permute.xlu1 %2500 }
 0x135   : > { %v1447_v4 = vsel %vm1442_vm9, %v1414_v17, %v2487_v56  ;;  %v2503_v36 = vunpack.i.h.bf16 %v2501_v54  ;;  %v2502_v47 = vunpack.i.l.bf16 %v2501_v54  ;;  %v1448_v57 = vsel %vm1442_vm9, %v1415_v13, %v2488_v27 }
 0x136   : > { %v2496_v63 = vpop.permute.xlu0 %2495 }
 0x137   : > { %v2498_v46 = vunpack.i.h.bf16 %v2496_v63  ;;  %v2497_v43 = vunpack.i.l.bf16 %v2496_v63  ;;  %v1465_v12 = vsel %vm1442_vm9, %v1432_v15, %v2502_v47  ;;  %v1466_v30 = vsel %vm1442_vm9, %v1433_v59, %v2503_v36 }
 0x138   : > { %v2511_v21 = vpop.permute.xlu1 %2510 }
 0x139   : > { %v2513_v41 = vunpack.i.h.bf16 %v2511_v21  ;;  %v2512_v35 = vunpack.i.l.bf16 %v2511_v21  ;;  %v1449_v33 = vsel %vm1442_vm9, %v1416_v20, %v2497_v43  ;;  %v1450_v60 = vsel %vm1442_vm9, %v1417_v22, %v2498_v46  ;;  %v4479_v21 = vld [vmem:[#allocation8_spill] sm:$0xff] }
 0x13a   : > { %v2506_v44 = vpop.permute.xlu0 %2505 }
 0x13b   : > { %v1496_v31 = vsel %vm1475_vm10, %v1463_v1, %v2512_v35  ;;  %v1497_v6 = vsel %vm1475_vm10, %v1464_v29, %v2513_v41  ;;  %v2508_v42 = vunpack.i.h.bf16 %v2506_v44  ;;  %v2507_v8 = vunpack.i.l.bf16 %v2506_v44  ;;  %v4480_v1 = vld [vmem:[#allocation11_spill] sm:$0xff]  ;;  %v4481_v35 = vld [vmem:[#allocation20_spill] sm:$0xff] }
 0x13c   : > { %v1518_v2 = vpack.c.bf16 %v1497_v6, %v1496_v31  ;;  %v2521_v26 = vpop.permute.xlu1 %2520  ;;  %v4483_v6 = vld [vmem:[#allocation16_spill] sm:$0xff] }
 0x13d   : > { %v1480_v0 = vsel %vm1475_vm10, %v1447_v4, %v2507_v8  ;;  %v1481_v18 = vsel %vm1475_vm10, %v1448_v57, %v2508_v42  ;;  %v2523_v50 = vunpack.i.h.bf16 %v2521_v26  ;;  %v2522_v9 = vunpack.i.l.bf16 %v2521_v26  ;;  %v4482_v4 = vld [vmem:[#allocation23_spill] sm:$0xff]  ;;  %v4484_v42 = vld [vmem:[#allocation9_spill] sm:$0xff] }
 0x13e   : > { %v1510_v14 = vpack.c.bf16 %v1481_v18, %v1480_v0  ;;  %v2516_v5 = vpop.permute.xlu0 %2515  ;;  %2004 = vmatprep.mubr.msk.bf16.mxu1 %vm1551_vm11, %v1518_v2 }
 0x13f   : > { %v1498_v39 = vsel %vm1475_vm10, %v1465_v12, %v2522_v9  ;;  %v1499_v24 = vsel %vm1475_vm10, %v1466_v30, %v2523_v50  ;;  %v2518_v38 = vunpack.i.h.bf16 %v2516_v5  ;;  %v2517_v32 = vunpack.i.l.bf16 %v2516_v5 }
 0x140   : > { %v1519_v23 = vpack.c.bf16 %v1499_v24, %v1498_v39  ;;  %1988 = vmatprep.mubr.msk.bf16.mxu0 %vm1551_vm11, %v1510_v14  ;;  %v2531_v11 = vpop.permute.xlu1 %2530 }
 0x141   : > { %v1482_v51 = vsel %vm1475_vm10, %v1449_v33, %v2517_v32  ;;  %v1483_v55 = vsel %vm1475_vm10, %v1450_v60, %v2518_v38  ;;  %v2533_v19 = vunpack.i.h.bf16 %v2531_v11  ;;  %v2532_v49 = vunpack.i.l.bf16 %v2531_v11 }
 0x142   : > { %v1511_v37 = vpack.c.bf16 %v1483_v55, %v1482_v51  ;;  %v2526_v58 = vpop.permute.xlu0 %2525  ;;  %2005 = vmatmul.mubr.msk.bf16.gmra.mrb[4].mxu1 %vm1551_vm11, %v1519_v23 }
 0x143   : > { %v2528_v3 = vunpack.i.h.bf16 %v2526_v58  ;;  %v2527_v28 = vunpack.i.l.bf16 %v2526_v58  ;;  %v1368_v59 = vsel %vm1343_vm6, %v3707_v62, %v2532_v49  ;;  %v1369_v27 = vsel %vm1343_vm6, %v4478_v16, %v2533_v19 }
 0x144   : > { %1989 = vmatmul.mubr.msk.bf16.gmra.mrb[4].mxu0 %vm1551_vm11, %v1511_v37  ;;  %v2541_v52 = vpop.permute.xlu1 %2540 }
 0x145   : > { %v2543_v48 = vunpack.i.h.bf16 %v2541_v52  ;;  %v2542_v56 = vunpack.i.l.bf16 %v2541_v52  ;;  %v1352_v20 = vsel %vm1343_vm6, %v4479_v21, %v2527_v28  ;;  %v1353_v41 = vsel %vm1343_vm6, %v4480_v1, %v2528_v3 }
 0x146   : > { %v2536_v45 = vpop.permute.xlu0 %2535 }
 0x147   : > { %v2538_v7 = vunpack.i.h.bf16 %v2536_v45  ;;  %v2537_v25 = vunpack.i.l.bf16 %v2536_v45  ;;  %v1370_v29 = vsel %vm1343_vm6, %v4481_v35, %v2542_v56  ;;  %v1371_v36 = vsel %vm1343_vm6, %v4482_v4, %v2543_v48 }
 0x148   : > { %v2551_v10 = vpop.permute.xlu1 %2550 }
 0x149   : > { %v2553_v17 = vunpack.i.h.bf16 %v2551_v10  ;;  %v2552_v13 = vunpack.i.l.bf16 %v2551_v10  ;;  %v1355_v62 = vsel %vm1343_vm6, %v4483_v6, %v2538_v7  ;;  %v1354_v8 = vsel %vm1343_vm6, %v4484_v42, %v2537_v25 }
 0x14a   : > { %v2546_v61 = vpop.permute.xlu0 %2545 }
 0x14b   : > { %v2548_v47 = vunpack.i.h.bf16 %v2546_v61  ;;  %v2547_v44 = vunpack.i.l.bf16 %v2546_v61  ;;  %v1401_v43 = vsel %vm1376_vm7, %v1368_v59, %v2552_v13  ;;  %v1402_v2 = vsel %vm1376_vm7, %v1369_v27, %v2553_v17 }
 0x14c   : > { %v2561_v53 = vpop.permute.xlu1 %2560 }
 0x14d   : > { %v2563_v57 = vunpack.i.h.bf16 %v2561_v53  ;;  %v2562_v46 = vunpack.i.l.bf16 %v2561_v53  ;;  %v1385_v30 = vsel %vm1376_vm7, %v1352_v20, %v2547_v44  ;;  %v1386_v14 = vsel %vm1376_vm7, %v1353_v41, %v2548_v47 }
 0x14e   : > { %v2556_v54 = vpop.permute.xlu0 %2555 }
 0x14f   : > { %v2558_v26 = vunpack.i.h.bf16 %v2556_v54  ;;  %v2557_v0 = vunpack.i.l.bf16 %v2556_v54  ;;  %v1403_v38 = vsel %vm1376_vm7, %v1370_v29, %v2562_v46  ;;  %v1404_v32 = vsel %vm1376_vm7, %v1371_v36, %v2563_v57 }
 0x150   : > { %v2571_v34 = vpop.permute.xlu1 %2570 }
 0x151   : > { %v2573_v50 = vunpack.i.h.bf16 %v2571_v34  ;;  %v2572_v9 = vunpack.i.l.bf16 %v2571_v34  ;;  %v1387_v23 = vsel %vm1376_vm7, %v1354_v8, %v2557_v0  ;;  %v1388_v11 = vsel %vm1376_vm7, %v1355_v62, %v2558_v26 }
 0x152   : > { %v2566_v40 = vpop.permute.xlu0 %2565 }
 0x153   : > { %v2568_v22 = vunpack.i.h.bf16 %v2566_v40  ;;  %v2567_v12 = vunpack.i.l.bf16 %v2566_v40  ;;  %v1434_v58 = vsel %vm1409_vm8, %v1401_v43, %v2572_v9  ;;  %v1435_v52 = vsel %vm1409_vm8, %v1402_v2, %v2573_v50 }
 0x154   : > { %v2581_v63 = vpop.permute.xlu1 %2580 }
 0x155   : > { %v2583_v5 = vunpack.i.h.bf16 %v2581_v63  ;;  %v2582_v39 = vunpack.i.l.bf16 %v2581_v63  ;;  %v1418_v45 = vsel %vm1409_vm8, %v1385_v30, %v2567_v12  ;;  %v1419_v10 = vsel %vm1409_vm8, %v1386_v14, %v2568_v22 }
 0x156   : > { %v4151_v15 = vpop.permute.xlu0 %2575 }
 0x157   : > { %v2577_v33 = vunpack.i.l.bf16 %v4151_v15  ;;  %v1436_v61 = vsel %vm1409_vm8, %v1403_v38, %v2582_v39  ;;  %v1437_v53 = vsel %vm1409_vm8, %v1404_v32, %v2583_v5  ;;  %v2578_v54 = vunpack.i.h.bf16 %v4151_v15 }
 0x158   : > { %v2591_v31 = vpop.permute.xlu1 %2590 }
 0x159   : > { %v2592_v60 = vunpack.i.l.bf16 %v2591_v31  ;;  %v2593_v51 = vunpack.i.h.bf16 %v2591_v31  ;;  %v1420_v19 = vsel %vm1409_vm8, %v1387_v23, %v2577_v33  ;;  %v1421_v36 = vsel %vm1409_vm8, %v1388_v11, %v2578_v54  ;;  %v4486_v54 = vld [vmem:[#allocation27_spill] sm:$0xff] }
 0x15a   : > { %v2586_v18 = vpop.permute.xlu0 %2585 }
 0x15b   : > { %v2587_v55 = vunpack.i.l.bf16 %v2586_v18  ;;  %v2588_v34 = vunpack.i.h.bf16 %v2586_v18  ;;  %v1467_v49 = vsel %vm1442_vm9, %v1434_v58, %v2592_v60  ;;  %v1468_v48 = vsel %vm1442_vm9, %v1435_v52, %v2593_v51 }
 0x15c   : > { %v2601_v24 = vpop.permute.xlu1 %2600 }
 0x15d   : > { %v1451_v56 = vsel %vm1442_vm9, %v1418_v45, %v2587_v55  ;;  %v2603_v63 = vunpack.i.h.bf16 %v2601_v24  ;;  %v2602_v7 = vunpack.i.l.bf16 %v2601_v24  ;;  %v1452_v16 = vsel %vm1442_vm9, %v1419_v10, %v2588_v34 }
 0x15e   : > { %v2596_v37 = vpop.permute.xlu0 %2595 }
 0x15f   : > { %v2598_v27 = vunpack.i.h.bf16 %v2596_v37  ;;  %v2597_v21 = vunpack.i.l.bf16 %v2596_v37  ;;  %v1469_v47 = vsel %vm1442_vm9, %v1436_v61, %v2602_v7  ;;  %v1470_v44 = vsel %vm1442_vm9, %v1437_v53, %v2603_v63  ;;  %v4485_v61 = vld [vmem:[#allocation26_spill] sm:$0xff] }
 0x160   : > { %v2611_v40 = vpop.permute.xlu1 %2610 }
 0x161   : > { %v2613_v3 = vunpack.i.h.bf16 %v2611_v40  ;;  %v2612_v28 = vunpack.i.l.bf16 %v2611_v40  ;;  %v1453_v46 = vsel %vm1442_vm9, %v1420_v19, %v2597_v21  ;;  %v1454_v43 = vsel %vm1442_vm9, %v1421_v36, %v2598_v27  ;;  %v4487_v40 = vld [vmem:[#allocation17_spill] sm:$0xff] }
 0x162   : > { %v2606_v25 = vpop.permute.xlu0 %2605 }
 0x163   : > { %v1500_v17 = vsel %vm1475_vm10, %v1467_v49, %v2612_v28  ;;  %v1501_v13 = vsel %vm1475_vm10, %v1468_v48, %v2613_v3  ;;  %v2608_v15 = vunpack.i.h.bf16 %v2606_v25  ;;  %v2607_v59 = vunpack.i.l.bf16 %v2606_v25  ;;  %v4488_v49 = vld [vmem:[#allocation22_spill] sm:$0xff]  ;;  %v4489_v28 = vld [vmem:[#allocation24_spill] sm:$0xff] }
 0x164   : > { %v1520_v20 = vpack.c.bf16 %v1501_v13, %v1500_v17  ;;  %v2621_v1 = vpop.permute.xlu1 %2620  ;;  %v4491_v13 = vld [vmem:[#allocation13_spill] sm:$0xff] }
 0x165   : > { %v1484_v41 = vsel %vm1475_vm10, %v1451_v56, %v2607_v59  ;;  %v1485_v35 = vsel %vm1475_vm10, %v1452_v16, %v2608_v15  ;;  %v2623_v29 = vunpack.i.h.bf16 %v2621_v1  ;;  %v2622_v4 = vunpack.i.l.bf16 %v2621_v1  ;;  %v4490_v56 = vld [vmem:[#allocation25_spill] sm:$0xff]  ;;  %v4492_v59 = vld [vmem:[#allocation10_spill] sm:$0xff] }
 0x166   : > { %v1512_v31 = vpack.c.bf16 %v1485_v35, %v1484_v41  ;;  %v2616_v6 = vpop.permute.xlu0 %2615  ;;  %2008 = vmatprep.mubr.msk.bf16.mxu1 %vm1551_vm11, %v1520_v20 }
 0x167   : > { %v1502_v62 = vsel %vm1475_vm10, %v1469_v47, %v2622_v4  ;;  %v1503_v42 = vsel %vm1475_vm10, %v1470_v44, %v2623_v29  ;;  %v2618_v8 = vunpack.i.h.bf16 %v2616_v6  ;;  %v2617_v57 = vunpack.i.l.bf16 %v2616_v6 }
 0x168   : > { %v1521_v2 = vpack.c.bf16 %v1503_v42, %v1502_v62  ;;  %1992 = vmatprep.mubr.msk.bf16.mxu0 %vm1551_vm11, %v1512_v31  ;;  %v2631_v26 = vpop.permute.xlu1 %2630 }
 0x169   : > { %v1486_v0 = vsel %vm1475_vm10, %v1453_v46, %v2617_v57  ;;  %v1487_v18 = vsel %vm1475_vm10, %v1454_v43, %v2618_v8  ;;  %v2633_v32 = vunpack.i.h.bf16 %v2631_v26  ;;  %v2632_v33 = vunpack.i.l.bf16 %v2631_v26 }
 0x16a   : > { %v1513_v50 = vpack.c.bf16 %v1487_v18, %v1486_v0  ;;  %v2626_v9 = vpop.permute.xlu0 %2625  ;;  %2009 = vmatmul.mubr.msk.bf16.gmra.mrb[8].mxu1 %vm1551_vm11, %v1521_v2 }
 0x16b   : > { %v2628_v60 = vunpack.i.h.bf16 %v2626_v9  ;;  %v2627_v23 = vunpack.i.l.bf16 %v2626_v9  ;;  %v1372_v53 = vsel %vm1343_vm6, %v4485_v61, %v2632_v33  ;;  %v1373_v34 = vsel %vm1343_vm6, %v4486_v54, %v2633_v32 }
 0x16c   : > { %1993 = vmatmul.mubr.msk.bf16.gmra.mrb[8].mxu0 %vm1551_vm11, %v1513_v50  ;;  %v2641_v22 = vpop.permute.xlu1 %2640 }
 0x16d   : > { %v2643_v11 = vunpack.i.h.bf16 %v2641_v22  ;;  %v2642_v51 = vunpack.i.l.bf16 %v2641_v22  ;;  %v1356_v19 = vsel %vm1343_vm6, %v4487_v40, %v2627_v23  ;;  %v1357_v3 = vsel %vm1343_vm6, %v4488_v49, %v2628_v60 }
 0x16e   : > { %v2636_v12 = vpop.permute.xlu0 %2635 }
 0x16f   : > { %v2638_v37 = vunpack.i.h.bf16 %v2636_v12  ;;  %v2637_v58 = vunpack.i.l.bf16 %v2636_v12  ;;  %v1374_v48 = vsel %vm1343_vm6, %v4489_v28, %v2642_v51  ;;  %v1375_v63 = vsel %vm1343_vm6, %v4490_v56, %v2643_v11 }
 0x170   : > { %v2651_v30 = vpop.permute.xlu1 %2650 }
 0x171   : > { %v2653_v52 = vunpack.i.h.bf16 %v2651_v30  ;;  %v2652_v45 = vunpack.i.l.bf16 %v2651_v30  ;;  %v1359_v15 = vsel %vm1343_vm6, %v4491_v13, %v2638_v37  ;;  %v1358_v16 = vsel %vm1343_vm6, %v4492_v59, %v2637_v58 }
 0x172   : > { %v2646_v14 = vpop.permute.xlu0 %2645 }
 0x173   : > { %v2648_v7 = vunpack.i.h.bf16 %v2646_v14  ;;  %v2647_v25 = vunpack.i.l.bf16 %v2646_v14  ;;  %v1405_v20 = vsel %vm1376_vm7, %v1372_v53, %v2652_v45  ;;  %v1406_v1 = vsel %vm1376_vm7, %v1373_v34, %v2653_v52 }
 0x174   : > { %v2661_v5 = vpop.permute.xlu1 %2660 }
 0x175   : > { %v2663_v27 = vunpack.i.h.bf16 %v2661_v5  ;;  %v2662_v21 = vunpack.i.l.bf16 %v2661_v5  ;;  %v1389_v31 = vsel %vm1376_vm7, %v1356_v19, %v2647_v25  ;;  %v1390_v6 = vsel %vm1376_vm7, %v1357_v3, %v2648_v7 }
 0x176   : > { %v2656_v39 = vpop.permute.xlu0 %2655 }
 0x177   : > { %v2658_v41 = vunpack.i.h.bf16 %v2656_v39  ;;  %v2657_v35 = vunpack.i.l.bf16 %v2656_v39  ;;  %v1407_v57 = vsel %vm1376_vm7, %v1374_v48, %v2662_v21  ;;  %v1408_v46 = vsel %vm1376_vm7, %v1375_v63, %v2663_v27 }
 0x178   : > { %v2671_v24 = vpop.permute.xlu1 %2670 }
 0x179   : > { %v2673_v4 = vunpack.i.h.bf16 %v2671_v24  ;;  %v2672_v36 = vunpack.i.l.bf16 %v2671_v24  ;;  %v1391_v26 = vsel %vm1376_vm7, %v1358_v16, %v2657_v35  ;;  %v1392_v0 = vsel %vm1376_vm7, %v1359_v15, %v2658_v41 }
 0x17a   : > { %v2666_v38 = vpop.permute.xlu0 %2665 }
 0x17b   : > { %v2668_v47 = vunpack.i.h.bf16 %v2666_v38  ;;  %v2667_v44 = vunpack.i.l.bf16 %v2666_v38  ;;  %v1438_v22 = vsel %vm1409_vm8, %v1405_v20, %v2672_v36  ;;  %v1439_v12 = vsel %vm1409_vm8, %v1406_v1, %v2673_v4  ;;  %v4267_v4 = vld [vmem:[%s4377_s2] ss:$0 sm:$0xff] }
 0x17c   : > { %v2681_v55 = vpop.permute.xlu1 %2680 }
 0x17d   : > { %v2683_v62 = vunpack.i.h.bf16 %v2681_v55  ;;  %v2682_v42 = vunpack.i.l.bf16 %v2681_v55  ;;  %v1422_v30 = vsel %vm1409_vm8, %v1389_v31, %v2667_v44  ;;  %v1423_v14 = vsel %vm1409_vm8, %v1390_v6, %v2668_v47 }
 0x17e   : > { %v4208_v10 = vpop.permute.xlu0 %2675 }
 0x17f   : > { %v2677_v43 = vunpack.i.l.bf16 %v4208_v10  ;;  %v1440_v5 = vsel %vm1409_vm8, %v1407_v57, %v2682_v42  ;;  %v1441_v39 = vsel %vm1409_vm8, %v1408_v46, %v2683_v62  ;;  %v2678_v24 = vunpack.i.h.bf16 %v4208_v10 }
 0x180   : > { %v2691_v17 = vpop.permute.xlu1 %2690 }
 0x181   : > { %v2692_v2 = vunpack.i.l.bf16 %v2691_v17  ;;  %v2693_v18 = vunpack.i.h.bf16 %v2691_v17  ;;  %v1424_v33 = vsel %vm1409_vm8, %v1391_v26, %v2677_v43  ;;  %v1425_v63 = vsel %vm1409_vm8, %v1392_v0, %v2678_v24 }
 0x182   : > { %v2686_v29 = vpop.permute.xlu0 %2685 }
 0x183   : > { %v2687_v50 = vunpack.i.l.bf16 %v2686_v29  ;;  %v2688_v38 = vunpack.i.h.bf16 %v2686_v29  ;;  %v1471_v60 = vsel %vm1442_vm9, %v1438_v22, %v2692_v2  ;;  %v1472_v51 = vsel %vm1442_vm9, %v1439_v12, %v2693_v18 }
 0x184   : > { %v2701_v8 = vpop.permute.xlu1 %2700 }
 0x185   : > { %v1455_v55 = vsel %vm1442_vm9, %v1422_v30, %v2687_v50  ;;  %v2703_v37 = vunpack.i.h.bf16 %v2701_v8  ;;  %v2702_v58 = vunpack.i.l.bf16 %v2701_v8  ;;  %v1456_v54 = vsel %vm1442_vm9, %v1423_v14, %v2688_v38 }
 0x186   : > { %v2696_v9 = vpop.permute.xlu0 %2695 }
 0x187   : > { %v2698_v34 = vunpack.i.h.bf16 %v2696_v9  ;;  %v2697_v40 = vunpack.i.l.bf16 %v2696_v9  ;;  %v1473_v7 = vsel %vm1442_vm9, %v1440_v5, %v2702_v58  ;;  %v1474_v25 = vsel %vm1442_vm9, %v1441_v39, %v2703_v37 }
 0x188   : > { %v2711_v32 = vpop.permute.xlu1 %2710 }
 0x189   : > { %v2713_v23 = vunpack.i.h.bf16 %v2711_v32  ;;  %v2712_v11 = vunpack.i.l.bf16 %v2711_v32  ;;  %v1457_v21 = vsel %vm1442_vm9, %v1424_v33, %v2697_v40  ;;  %v1458_v20 = vsel %vm1442_vm9, %v1425_v63, %v2698_v34 }
 0x18a   : > { %v2706_v52 = vpop.permute.xlu0 %2705 }
 0x18b   : > { %v1504_v45 = vsel %vm1475_vm10, %v1471_v60, %v2712_v11  ;;  %v1505_v61 = vsel %vm1475_vm10, %v1472_v51, %v2713_v23  ;;  %v2708_v10 = vunpack.i.h.bf16 %v2706_v52  ;;  %v2707_v53 = vunpack.i.l.bf16 %v2706_v52 }
 0x18c   : > { %v1522_v19 = vpack.c.bf16 %v1505_v61, %v1504_v45  ;;  %v2721_v49 = vpop.permute.xlu1 %2720 }
 0x18d   : > { %v1488_v3 = vsel %vm1475_vm10, %v1455_v55, %v2707_v53  ;;  %v1489_v28 = vsel %vm1475_vm10, %v1456_v54, %v2708_v10  ;;  %v2723_v48 = vunpack.i.h.bf16 %v2721_v49  ;;  %v2722_v56 = vunpack.i.l.bf16 %v2721_v49 }
 0x18e   : > { %v1514_v17 = vpack.c.bf16 %v1489_v28, %v1488_v3  ;;  %v2716_v13 = vpop.permute.xlu0 %2715  ;;  %2012 = vmatprep.mubr.msk.bf16.mxu1 %vm1551_vm11, %v1522_v19 }
 0x18f   : > { %v1506_v15 = vsel %vm1475_vm10, %v1473_v7, %v2722_v56  ;;  %v1507_v59 = vsel %vm1475_vm10, %v1474_v25, %v2723_v48  ;;  %v2718_v16 = vunpack.i.h.bf16 %v2716_v13  ;;  %v2717_v27 = vunpack.i.l.bf16 %v2716_v13 }
 0x190   : > { %v1523_v1 = vpack.c.bf16 %v1507_v59, %v1506_v15  ;;  %1996 = vmatprep.mubr.msk.bf16.mxu0 %vm1551_vm11, %v1514_v17 }
 0x191   : > { %v1490_v41 = vsel %vm1475_vm10, %v1457_v21, %v2717_v27  ;;  %v1491_v35 = vsel %vm1475_vm10, %v1458_v20, %v2718_v16 }
 0x192   : > { %v1515_v29 = vpack.c.bf16 %v1491_v35, %v1490_v41  ;;  %2013 = vmatmul.mubr.msk.bf16.gmra.mrb[12].mxu1 %vm1551_vm11, %v1523_v1 }
 0x194   : > { %1997 = vmatmul.mubr.msk.bf16.gmra.mrb[12].mxu0 %vm1551_vm11, %v1515_v29 }
 0x1ed   : > { %v1986_v36 = vpop.f32.mrb[0].mxu0 }
 0x1ee   : > { %v1647_v47 = vadd.f32 %v1986_v36, %v4267_v4  ;;  %v1638_v44 = vpop.f32.mrb[1].mxu0 }
 0x1ef   : > { %v1639_v31 = vadd.f32 %v4267_v4, %v1638_v44  ;;  %v1987_v6 = vpop.f32.mrb[2].mxu0 }
 0x1f0   : > { %v1767_v62 = vmax.f32 %v1647_v47, 0.0  ;;  %v1650_v42 = vadd.f32 %v1987_v6, %v4267_v4  ;;  %v1641_v8 = vpop.f32.mrb[3].mxu0 }
 0x1f1   : > { %v1765_v57 = vmax.f32 %v1639_v31, 0.0  ;;  %v1642_v46 = vadd.f32 %v4267_v4, %v1641_v8 }
 0x1f2   : > { %1799 = vst [vmem:[%s4275_s28 + $0x10] sm:$0xff] %v1767_v62  ;;  %v1768_v43 = vmax.f32 %v1650_v42, 0.0 }
 0x1f3   : > { %1797 = vst [vmem:[%s4275_s28] sm:$0xff] %v1765_v57  ;;  %v1766_v2 = vmax.f32 %v1642_v46, 0.0  ;;  %v2002_v26 = vpop.f32.mrb[0].mxu1 }
 0x1f4   : > { %1800 = vst [vmem:[%s4275_s28 + $0x18] sm:$0xff] %v1768_v43  ;;  %v1711_v0 = vadd.f32 %v2002_v26, %v4267_v4  ;;  %v1702_v18 = vpop.f32.mrb[1].mxu1 }
 0x1f5   : > { %1798 = vst [vmem:[%s4275_s28 + $0x8] sm:$0xff] %v1766_v2  ;;  %v1703_v50 = vadd.f32 %v4267_v4, %v1702_v18  ;;  %v2003_v9 = vpop.f32.mrb[2].mxu1 }
 0x1f6   : > { %v1783_v22 = vmax.f32 %v1711_v0, 0.0  ;;  %v1714_v12 = vadd.f32 %v2003_v9, %v4267_v4  ;;  %v1705_v30 = vpop.f32.mrb[3].mxu1 }
 0x1f7   : > { %v1781_v14 = vmax.f32 %v1703_v50, 0.0  ;;  %v1706_v5 = vadd.f32 %v4267_v4, %v1705_v30 }
 0x1f8   : > { %1815 = vst [vmem:[%s4275_s28 + $0x90] sm:$0xff] %v1783_v22  ;;  %v1784_v39 = vmax.f32 %v1714_v12, 0.0 }
 0x1f9   : > { %1813 = vst [vmem:[%s4275_s28 + $0x80] sm:$0xff] %v1781_v14  ;;  %v1782_v24 = vmax.f32 %v1706_v5, 0.0 }
 0x1fa   : > { %1816 = vst [vmem:[%s4275_s28 + $0x98] sm:$0xff] %v1784_v39 }
 0x1fb   : > { %1814 = vst [vmem:[%s4275_s28 + $0x88] sm:$0xff] %v1782_v24 }
 0x215   : > { %v2006_v38 = vpop.f32.mrb[4].mxu1 }
 0x216   : > { %v1727_v32 = vadd.f32 %v2006_v38, %v4267_v4  ;;  %v1718_v33 = vpop.f32.mrb[5].mxu1 }
 0x217   : > { %v1990_v60 = vpop.f32.mrb[4].mxu0  ;;  %v1719_v23 = vadd.f32 %v4267_v4, %v1718_v33  ;;  %v2007_v11 = vpop.f32.mrb[6].mxu1 }
 0x218   : > { %v1663_v51 = vadd.f32 %v1990_v60, %v4267_v4  ;;  %v1787_v55 = vmax.f32 %v1727_v32, 0.0  ;;  %v1654_v37 = vpop.f32.mrb[5].mxu0  ;;  %v1730_v58 = vadd.f32 %v2007_v11, %v4267_v4  ;;  %v1721_v52 = vpop.f32.mrb[7].mxu1 }
 0x219   : > { %v1655_v45 = vadd.f32 %v4267_v4, %v1654_v37  ;;  %v1785_v61 = vmax.f32 %v1719_v23, 0.0  ;;  %v1991_v10 = vpop.f32.mrb[6].mxu0  ;;  %v1722_v53 = vadd.f32 %v4267_v4, %v1721_v52 }
 0x21a   : > { %v1771_v54 = vmax.f32 %v1663_v51, 0.0  ;;  %1819 = vst [vmem:[%s4275_s28 + $0xb0] sm:$0xff] %v1787_v55  ;;  %v1666_v34 = vadd.f32 %v1991_v10, %v4267_v4  ;;  %v1788_v40 = vmax.f32 %v1730_v58, 0.0  ;;  %v1657_v19 = vpop.f32.mrb[7].mxu0 }
 0x21b   : > { %v1769_v49 = vmax.f32 %v1655_v45, 0.0  ;;  %1817 = vst [vmem:[%s4275_s28 + $0xa0] sm:$0xff] %v1785_v61  ;;  %v1658_v3 = vadd.f32 %v4267_v4, %v1657_v19  ;;  %v1786_v28 = vmax.f32 %v1722_v53, 0.0 }
 0x21c   : > { %1803 = vst [vmem:[%s4275_s28 + $0x30] sm:$0xff] %v1771_v54  ;;  %v1772_v48 = vmax.f32 %v1666_v34, 0.0  ;;  %1820 = vst [vmem:[%s4275_s28 + $0xb8] sm:$0xff] %v1788_v40 }
 0x21d   : > { %1801 = vst [vmem:[%s4275_s28 + $0x20] sm:$0xff] %v1769_v49  ;;  %v1770_v56 = vmax.f32 %v1658_v3, 0.0  ;;  %1818 = vst [vmem:[%s4275_s28 + $0xa8] sm:$0xff] %v1786_v28 }
 0x21e   : > { %1804 = vst [vmem:[%s4275_s28 + $0x38] sm:$0xff] %v1772_v48 }
 0x21f   : > { %1802 = vst [vmem:[%s4275_s28 + $0x28] sm:$0xff] %v1770_v56 }
 0x23d   : > { %v2010_v63 = vpop.f32.mrb[8].mxu1 }
 0x23e   : > { %v1743_v7 = vadd.f32 %v2010_v63, %v4267_v4  ;;  %v1734_v25 = vpop.f32.mrb[9].mxu1 }
 0x23f   : > { %v1994_v17 = vpop.f32.mrb[8].mxu0  ;;  %v1735_v13 = vadd.f32 %v4267_v4, %v1734_v25  ;;  %v2011_v15 = vpop.f32.mrb[10].mxu1 }
 0x240   : > { %v1679_v59 = vadd.f32 %v1994_v17, %v4267_v4  ;;  %v1791_v16 = vmax.f32 %v1743_v7, 0.0  ;;  %v1670_v27 = vpop.f32.mrb[9].mxu0  ;;  %v1746_v21 = vadd.f32 %v2011_v15, %v4267_v4  ;;  %v1737_v20 = vpop.f32.mrb[11].mxu1 }
 0x241   : > { %v1671_v1 = vadd.f32 %v4267_v4, %v1670_v27  ;;  %v1789_v41 = vmax.f32 %v1735_v13, 0.0  ;;  %v1995_v35 = vpop.f32.mrb[10].mxu0  ;;  %v1738_v29 = vadd.f32 %v4267_v4, %v1737_v20 }
 0x242   : > { %v1775_v36 = vmax.f32 %v1679_v59, 0.0  ;;  %1823 = vst [vmem:[%s4275_s28 + $0xd0] sm:$0xff] %v1791_v16  ;;  %v1682_v47 = vadd.f32 %v1995_v35, %v4267_v4  ;;  %v1792_v44 = vmax.f32 %v1746_v21, 0.0  ;;  %v1673_v31 = vpop.f32.mrb[11].mxu0 }
 0x243   : > { %v1773_v6 = vmax.f32 %v1671_v1, 0.0  ;;  %1821 = vst [vmem:[%s4275_s28 + $0xc0] sm:$0xff] %v1789_v41  ;;  %v1674_v62 = vadd.f32 %v4267_v4, %v1673_v31  ;;  %v1790_v42 = vmax.f32 %v1738_v29, 0.0 }
 0x244   : > { %1807 = vst [vmem:[%s4275_s28 + $0x50] sm:$0xff] %v1775_v36  ;;  %v1776_v8 = vmax.f32 %v1682_v47, 0.0  ;;  %1824 = vst [vmem:[%s4275_s28 + $0xd8] sm:$0xff] %v1792_v44 }
 0x245   : > { %1805 = vst [vmem:[%s4275_s28 + $0x40] sm:$0xff] %v1773_v6  ;;  %v1774_v57 = vmax.f32 %v1674_v62, 0.0  ;;  %1822 = vst [vmem:[%s4275_s28 + $0xc8] sm:$0xff] %v1790_v42 }
 0x246   : > { %1808 = vst [vmem:[%s4275_s28 + $0x58] sm:$0xff] %v1776_v8 }
 0x247   : > { %1806 = vst [vmem:[%s4275_s28 + $0x48] sm:$0xff] %v1774_v57 }
 0x265   : > { %v2014_v46 = vpop.f32.mrb[12].mxu1 }
 0x266   : > { %v1759_v43 = vadd.f32 %v2014_v46, %v4267_v4  ;;  %v1750_v2 = vpop.f32.mrb[13].mxu1 }
 0x267   : > { %v1998_v26 = vpop.f32.mrb[12].mxu0  ;;  %v1751_v0 = vadd.f32 %v4267_v4, %v1750_v2  ;;  %v2015_v18 = vpop.f32.mrb[14].mxu1 }
 0x268   : > { %v1695_v50 = vadd.f32 %v1998_v26, %v4267_v4  ;;  %v1795_v9 = vmax.f32 %v1759_v43, 0.0  ;;  %v1686_v22 = vpop.f32.mrb[13].mxu0  ;;  %v1762_v12 = vadd.f32 %v2015_v18, %v4267_v4  ;;  %v1753_v30 = vpop.f32.mrb[15].mxu1 }
 0x269   : > { %v1687_v14 = vadd.f32 %v4267_v4, %v1686_v22  ;;  %v1793_v5 = vmax.f32 %v1751_v0, 0.0  ;;  %v1999_v39 = vpop.f32.mrb[14].mxu0  ;;  %v1754_v24 = vadd.f32 %v4267_v4, %v1753_v30 }
 0x26a   : > { %v1779_v38 = vmax.f32 %v1695_v50, 0.0  ;;  %1827 = vst [vmem:[%s4275_s28 + $0xf0] sm:$0xff] %v1795_v9  ;;  %v1698_v32 = vadd.f32 %v1999_v39, %v4267_v4  ;;  %v1796_v33 = vmax.f32 %v1762_v12, 0.0  ;;  %v1689_v60 = vpop.f32.mrb[15].mxu0 }
 0x26b   : > { %v1777_v23 = vmax.f32 %v1687_v14, 0.0  ;;  %1825 = vst [vmem:[%s4275_s28 + $0xe0] sm:$0xff] %v1793_v5  ;;  %v1690_v11 = vadd.f32 %v4267_v4, %v1689_v60  ;;  %v1794_v51 = vmax.f32 %v1754_v24, 0.0 }
 0x26c   : > { %1811 = vst [vmem:[%s4275_s28 + $0x70] sm:$0xff] %v1779_v38  ;;  %v1780_v55 = vmax.f32 %v1698_v32, 0.0  ;;  %1828 = vst [vmem:[%s4275_s28 + $0xf8] sm:$0xff] %v1796_v33 }
 0x26d   : > { %1809 = vst [vmem:[%s4275_s28 + $0x60] sm:$0xff] %v1777_v23  ;;  %v1778_v37 = vmax.f32 %v1690_v11, 0.0  ;;  %1826 = vst [vmem:[%s4275_s28 + $0xe8] sm:$0xff] %v1794_v51 }
 0x26e   : > { %1812 = vst [vmem:[%s4275_s28 + $0x78] sm:$0xff] %v1780_v55 }
 0x26f   : > { %1810 = vst [vmem:[%s4275_s28 + $0x68] sm:$0xff] %v1778_v37 }
 0x270   : > { %s1958_s30 = sshll.u32 %s2839_s16, 11  ;;  %s1860_s4 = sshll.u32 %s4275_s28, 4  ;;  %s1861_s4 = int_to_ptr.vmem [resolvable:$true] %s1860_s4 }
 0x271   : > { %s1843_s7 = scalar_lea.hbm %s4378_s3, %s1958_s30  ;;  %s2791_s8 = smov 2048  }
 0x272   : > { %2024 = sst [smem:[#allocation5]] (%p2856_p5), %s2791_s8  ;;  %s2792_s9 = smov 4096  }
 0x273   : > { %2025 = sst [smem:[#allocation5 + $0x1]] (%p2856_p5), %s2792_s9  ;;  %s2793_s10 = smov 16  }
 0x274   : > { %2026 = sst [smem:[#allocation5 + $0x2]] (%p2856_p5), %s2793_s10  ;;  %s2794_s11 = smov 128  }
 0x275   : > { %2027 = sst [smem:[#allocation5 + $0x3]] (%p2856_p5), %s2794_s11  ;;  %s2795_s16 = smov 8  }
 0x276   : > { %2028 = sst [smem:[#allocation5 + $0x4]] (%p2856_p5), %s2794_s11  ;;  %s2796_s17 = smov [#allocation4]  }
 0x277   : > { %2029 = sst [smem:[#allocation5 + $0x5]] (%p2856_p5), %s2795_s16  ;;  %s2797_s19 = smov 0  }
 0x278   : > { %2030 = dma.general (%p2856_p5), %s1861_s4, 4096, %s1843_s7, %s1830_s29, %s2796_s17, [#allocation5], %s2797_s19, 0  }
 0x279 PF: > { %p2036_p10 = scmp.ge.s32.totalorder %s2781_s15, 2  ;;  %s1888_s20 = sand.u32 1, %s2769_s12  }
 0x27a   : > { %s1889_s24 = scalar_lea.sflag [#allocation3], %s1888_s20 }
 0x27b   : > { %p2033_p11 = pnand %p2036_p10, %p2860_p6 }
 0x27d   : > { %2764 = dma.done.wait (!%p2033_p11), %s1889_s24, 4096  }
 0x27e   : > { %2766 = vsyncadd (!%p2033_p11), %s1889_s24, 4294963200  ;;  %p13_p12 = scmp.ge.s32.totalorder %s2843_s18, 4   ;;  %s4493_s12 = smov %s2773_s13 }
 0x27f   : > { %s4494_s13 = smov %s2777_s14  ;;  %s4495_s14 = smov %s2854_s21 }
 0x280   : > { %s4496_s15 = smov %s2843_s18  ;;  %15 = sbr.rel (!%p13_p12) target bundleno = 3 (0x3), region = 70 }
 0x287   :  { %1894 = vsyncpa [#allocation3], 1 }
 0x288   :  { %1896 = vsyncpa [#allocation3 + $0x1], 1 }

</bundles_post_ra>
